<compile_context>
chip_gen: v6e
topology: v6e:2x2x1
jax: 0.10.0
libtpu: 0.0.40
codegen_flags: <defaults>
</compile_context>

<pallas_src>
import functools

import jax
import jax.numpy as jnp
from jax import lax
from jax.experimental import pallas as pl
from jax.experimental.pallas import tpu as pltpu


def _same_pad_seq(a, pad_l, pad_r):
    """'same' conv padding along the sequence (second-minor) axis, in VMEM."""
    B, _, C = a.shape
    parts = []
    if pad_l:
        parts.append(jnp.zeros((B, pad_l, C), a.dtype))
    parts.append(a)
    if pad_r:
        parts.append(jnp.zeros((B, pad_r, C), a.dtype))
    return jnp.concatenate(parts, axis=1) if len(parts) > 1 else a


# --------------------------------------------------------------------------
# Kernel 1: variance/duration predictor (conv1d x2 + ReLU + LN + linear),
#           inference-time quantisation ((exp(d)-1)*alpha + 0.5).int() clamped
#           at 0, and the per-phoneme [start, end) frame offsets (cumsum).
# --------------------------------------------------------------------------
def _variance_predictor_kernel(alpha, K,
                               x_ref,
                               w1_ref, b1_ref, g1_ref, beta1_ref,
                               w2_ref, b2_ref, g2_ref, beta2_ref,
                               wl_ref, bl_ref,
                               starts_ref, ends_ref):
    eps = 1e-5
    B, L, D = x_ref.shape
    F_ = w1_ref.shape[-1]
    pad_l = (K - 1) // 2
    pad_r = K - 1 - pad_l

    x = x_ref[...].astype(jnp.float32)                          # (B, L, D)

    # ---- Conv1d #1: im2col slab + single MXU push (contraction K*D) ----
    xp = _same_pad_seq(x, pad_l, pad_r)                         # (B, L+K-1, D)
    slab = jnp.concatenate([xp[:, k:k + L, :] for k in range(K)], axis=-1)
    slab = slab.reshape(B * L, K * D)                           # (B*L, K*D)
    w1 = w1_ref[...].reshape(K * D, F_)                         # (k,d) row-major == slab cols
    h = jnp.dot(slab.astype(jnp.bfloat16), w1.astype(jnp.bfloat16),
                preferred_element_type=jnp.float32)             # (B*L, F)
    h = h + b1_ref[...].astype(jnp.float32)
    h = jnp.maximum(h, 0.0)                                     # ReLU
    mu = jnp.mean(h, axis=-1, keepdims=True)                    # LayerNorm over channels
    var = jnp.mean((h - mu) ** 2, axis=-1, keepdims=True)
    h = (h - mu) * lax.rsqrt(var + eps)
    h = h * g1_ref[...].astype(jnp.float32) + beta1_ref[...].astype(jnp.float32)
    # Dropout: identity in eval mode.

    # ---- Conv1d #2 (same im2col trick, contraction K*F) ----
    hp = _same_pad_seq(h.reshape(B, L, F_), pad_l, pad_r)       # (B, L+K-1, F)
    slab2 = jnp.concatenate([hp[:, k:k + L, :] for k in range(K)], axis=-1)
    slab2 = slab2.reshape(B * L, K * F_)
    w2 = w2_ref[...].reshape(K * F_, F_)
    h2 = jnp.dot(slab2.astype(jnp.bfloat16), w2.astype(jnp.bfloat16),
                 preferred_element_type=jnp.float32)            # (B*L, F)
    h2 = h2 + b2_ref[...].astype(jnp.float32)
    h2 = jnp.maximum(h2, 0.0)
    mu2 = jnp.mean(h2, axis=-1, keepdims=True)
    var2 = jnp.mean((h2 - mu2) ** 2, axis=-1, keepdims=True)
    h2 = (h2 - mu2) * lax.rsqrt(var2 + eps)
    h2 = h2 * g2_ref[...].astype(jnp.float32) + beta2_ref[...].astype(jnp.float32)

    # ---- Linear(F, 1): VPU mul + lane reduce (avoid a lane-width-1 MXU result) ----
    prod = (h2 * wl_ref[...].astype(jnp.float32)).reshape(B, L, F_)
    d = jnp.sum(prod, axis=-1) + bl_ref[...].astype(jnp.float32)   # (B, L) log-durations

    # ---- inference quantisation: ((exp(d)-1)*alpha + 0.5).int(), clamp < 0 -> 0 ----
    # (floor == trunc here because of the >= 0 clamp and exp(d) - 1 > -1)
    q = jnp.maximum(jnp.floor((jnp.exp(d) - 1.0) * alpha + 0.5), 0.0)   # (B, L), int-valued f32
    dur_i = q.astype(jnp.int32)

    # ---- inclusive prefix sum via lower-triangular matmul (exact for small ints) ----
    row = lax.broadcasted_iota(jnp.int32, (L, L), 0)
    col = lax.broadcasted_iota(jnp.int32, (L, L), 1)
    tri = (row <= col).astype(jnp.float32)                      # tri[j, l] = 1 iff j <= l
    ends = jnp.dot(q, tri, preferred_element_type=jnp.float32).astype(jnp.int32)  # (B, L)

    starts_ref[:, 0, :] = ends - dur_i                          # exclusive cumsum
    ends_ref[:, 0, :] = ends                                    # inclusive cumsum


# --------------------------------------------------------------------------
# Kernel 2: LR expansion, tiled over T.  Equivalent to create_alignment + @:
#   align[t, j] = 1  iff  start[j] <= t < end[j];  rows t >= total are zero.
# --------------------------------------------------------------------------
def _length_regulate_kernel(x_ref, starts_ref, ends_ref, out_ref):
    T_tile = out_ref.shape[1]
    L = x_ref.shape[1]
    t0 = pl.program_id(1) * T_tile
    t_idx = t0 + lax.broadcasted_iota(jnp.int32, (T_tile, L), 0)
    s = starts_ref[0]                                           # (1, L) int32, broadcasts over T
    e = ends_ref[0]                                             # (1, L)
    # align entries are exactly 0/1 -> bf16 is lossless; x rows get bf16-rounded
    # (per perf review; keep f32 here if bit-exact copies are required).
    align = jnp.logical_and(t_idx >= s, t_idx < e).astype(jnp.bfloat16)   # (T_tile, L)
    out_ref[0] = jnp.dot(align, x_ref[0].astype(jnp.bfloat16),
                         preferred_element_type=jnp.float32).astype(out_ref.dtype)


# --------------------------------------------------------------------------
# Wrapper — fully jit-able (no host reads).  Returns the output padded to the
# static max_mel_len bound (zero rows past the true length, same as the
# PyTorch mel_max_length/F.pad branch), mel_pos, and the true mel length.
# --------------------------------------------------------------------------
def length_regulator_forward(x, params, *, alpha=1.0, max_mel_len=512,
                             t_tile=128, batch_tile=None):
    N, L, D = x.shape
    K, _, F_ = params["w1"].shape
    bt = N if batch_tile is None else min(batch_tile, N)
    assert N % bt == 0, "batch_tile must divide N"

    starts, ends = pl.pallas_call(
        functools.partial(_variance_predictor_kernel, float(alpha), K),
        grid=(N // bt,),
        in_specs=[
            pl.BlockSpec((bt, L, D), lambda i: (i, 0, 0)),
            pl.BlockSpec((K, D, F_), lambda i: (0, 0, 0)),
            pl.BlockSpec((1, F_), lambda i: (0, 0)),
            pl.BlockSpec((1, F_), lambda i: (0, 0)),
            pl.BlockSpec((1, F_), lambda i: (0, 0)),
            pl.BlockSpec((K, F_, F_), lambda i: (0, 0, 0)),
            pl.BlockSpec((1, F_), lambda i: (0, 0)),
            pl.BlockSpec((1, F_), lambda i: (0, 0)),
            pl.BlockSpec((1, F_), lambda i: (0, 0)),
            pl.BlockSpec((1, F_), lambda i: (0, 0)),
            pl.BlockSpec((1, 1), lambda i: (0, 0)),
        ],
        out_specs=[
            pl.BlockSpec((bt, 1, L), lambda i: (i, 0, 0)),
            pl.BlockSpec((bt, 1, L), lambda i: (i, 0, 0)),
        ],
        out_shape=[
            jax.ShapeDtypeStruct((N, 1, L), jnp.int32),   # frame start offsets
            jax.ShapeDtypeStruct((N, 1, L), jnp.int32),   # frame end offsets
        ],
        compiler_params=pltpu.CompilerParams(
            dimension_semantics=("parallel",),
            vmem_limit_bytes=32 * 1024 * 1024),
    )(x, params["w1"], params["b1"], params["g1"], params["beta1"],
      params["w2"], params["b2"], params["g2"], params["beta2"],
      params["wl"], params["bl"])

    num_t = pl.cdiv(max_mel_len, t_tile)
    T = num_t * t_tile                                          # static output length bound

    output = pl.pallas_call(
        _length_regulate_kernel,
        grid=(N, num_t),
        in_specs=[
            pl.BlockSpec((1, L, D), lambda n, t: (n, 0, 0)),
            pl.BlockSpec((1, 1, L), lambda n, t: (n, 0, 0)),
            pl.BlockSpec((1, 1, L), lambda n, t: (n, 0, 0)),
        ],
        out_specs=pl.BlockSpec((1, t_tile, D), lambda n, t: (n, t, 0)),
        out_shape=jax.ShapeDtypeStruct((N, T, D), x.dtype),
        compiler_params=pltpu.CompilerParams(
            dimension_semantics=("parallel", "parallel"),
            vmem_limit_bytes=32 * 1024 * 1024),
    )(x, starts, ends)

    mel_len = jnp.max(ends)                                     # device scalar (no host sync)
    # PyTorch uses int64 (.long()); int32 here (x64 disabled by default in JAX).
    mel_pos = (jnp.arange(T, dtype=jnp.int32) + 1)[None, :]
    return output, mel_pos, mel_len


# --------------------------------------------------------------------------
# Deterministic parameter init (synthetic, no checkpoint load)
# --------------------------------------------------------------------------
def init_params(key, encoder_dim, filter_size, kernel_size):
    k1, k2, k3 = jax.random.split(key, 3)
    D, F_, K = encoder_dim, filter_size, kernel_size
    return dict(
        w1=jax.random.normal(k1, (K, D, F_), jnp.float32) * (1.0 / (D * K) ** 0.5),
        b1=jnp.zeros((1, F_), jnp.float32),
        g1=jnp.ones((1, F_), jnp.float32),
        beta1=jnp.zeros((1, F_), jnp.float32),
        w2=jax.random.normal(k2, (K, F_, F_), jnp.float32) * (1.0 / (F_ * K) ** 0.5),
        b2=jnp.zeros((1, F_), jnp.float32),
        g2=jnp.ones((1, F_), jnp.float32),
        beta2=jnp.zeros((1, F_), jnp.float32),
        wl=jax.random.normal(k3, (1, F_), jnp.float32) * 0.01,   # small -> modest durations
        bl=jnp.full((1, 1), 1.0, jnp.float32),                   # positive bias -> nonzero durations
    )


if __name__ == "__main__":
    N, L, D = 2, 16, 128          # batch, phoneme sequence length, encoder_dim (lane-dense)
    F_, K = 128, 3                # duration_predictor_filter_size / kernel_size

    key = jax.random.PRNGKey(0)
    kx, kp = jax.random.split(key)
    x = jax.random.normal(kx, (N, L, D), jnp.float32)
    params = init_params(kp, D, F_, K)

    fwd = jax.jit(functools.partial(length_regulator_forward,
                                    alpha=1.0, max_mel_len=512, t_tile=128))
    output, mel_pos, mel_len = fwd(x, params)
    jax.block_until_ready(output)
    jax.block_until_ready(mel_pos)
    jax.block_until_ready(mel_len)
    print("KERNEL_OK")
</pallas_src>

<mosaic_0001>
module attributes {stable_mosaic.version = 11 : i64} {
  func.func @_length_regulate_kernel(%arg0: i32, %arg1: i32, %arg2: memref<1x16x128xf32, #tpu.memory_space<vmem>>, %arg3: memref<1x1x16xi32, #tpu.memory_space<vmem>>, %arg4: memref<1x1x16xi32, #tpu.memory_space<vmem>>, %arg5: memref<1x128x128xf32, #tpu.memory_space<vmem>>) attributes {dimension_semantics = [#tpu.dimension_semantics<parallel>, #tpu.dimension_semantics<parallel>], iteration_bounds = array<i64: 2, 4>, scalar_prefetch = 0 : i64, scratch_operands = 0 : i64, tpu.core_type = #tpu.core_type<tc>, window_params = [{transform_indices = @transform_0, window_bounds = array<i64: 1, 16, 128>}, {transform_indices = @transform_1, window_bounds = array<i64: 1, 1, 16>}, {transform_indices = @transform_2, window_bounds = array<i64: 1, 1, 16>}, {transform_indices = @transform_3, window_bounds = array<i64: 1, 128, 128>}]} {
    %c128_i32 = arith.constant 128 : i32
    %0 = arith.muli %arg1, %c128_i32 : i32
    %1 = tpu.iota {dimensions = array<i32: 0>} : vector<128x16xi32>
    %2 = vector.broadcast %0 : i32 to vector<128x16xi32>
    %3 = arith.addi %2, %1 : vector<128x16xi32>
    %c0 = arith.constant 0 : index
    %c0_0 = arith.constant 0 : index
    %c0_1 = arith.constant 0 : index
    %4 = vector.load %arg3[%c0, %c0_0, %c0_1] : memref<1x1x16xi32, #tpu.memory_space<vmem>>, vector<1x1x16xi32>
    %5 = vector.shape_cast %4 : vector<1x1x16xi32> to vector<1x16xi32>
    %c0_2 = arith.constant 0 : index
    %c0_3 = arith.constant 0 : index
    %c0_4 = arith.constant 0 : index
    %6 = vector.load %arg4[%c0_2, %c0_3, %c0_4] : memref<1x1x16xi32, #tpu.memory_space<vmem>>, vector<1x1x16xi32>
    %7 = vector.shape_cast %6 : vector<1x1x16xi32> to vector<1x16xi32>
    %8 = vector.broadcast %5 : vector<1x16xi32> to vector<128x16xi32>
    %9 = arith.cmpi sge, %3, %8 : vector<128x16xi32>
    %10 = vector.broadcast %7 : vector<1x16xi32> to vector<128x16xi32>
    %11 = arith.cmpi slt, %3, %10 : vector<128x16xi32>
    %12 = arith.andi %9, %11 : vector<128x16xi1>
    %13 = arith.extui %12 : vector<128x16xi1> to vector<128x16xi32>
    %14 = arith.sitofp %13 : vector<128x16xi32> to vector<128x16xf32>
    %15 = arith.truncf %14 : vector<128x16xf32> to vector<128x16xbf16>
    %c0_5 = arith.constant 0 : index
    %c0_6 = arith.constant 0 : index
    %c0_7 = arith.constant 0 : index
    %16 = vector.load %arg2[%c0_5, %c0_6, %c0_7] : memref<1x16x128xf32, #tpu.memory_space<vmem>>, vector<1x16x128xf32>
    %17 = vector.shape_cast %16 : vector<1x16x128xf32> to vector<16x128xf32>
    %18 = arith.truncf %17 : vector<16x128xf32> to vector<16x128xbf16>
    %cst = arith.constant dense<0.000000e+00> : vector<128x128xf32>
    %19 = tpu.matmul %15, %18, %cst {dimension_numbers = #tpu.dot_dimension_numbers<[1], [0], [0], [1], [0, 0, 1, 1], [], []>} : vector<128x16xbf16>, vector<16x128xbf16>, vector<128x128xf32> -> vector<128x128xf32>
    %c0_8 = arith.constant 0 : index
    %c0_9 = arith.constant 0 : index
    %c0_10 = arith.constant 0 : index
    %20 = vector.load %arg5[%c0_8, %c0_9, %c0_10] : memref<1x128x128xf32, #tpu.memory_space<vmem>>, vector<1x128x128xf32>
    %21 = vector.shape_cast %20 : vector<1x128x128xf32> to vector<128x128xf32>
    %22 = vector.shape_cast %19 : vector<128x128xf32> to vector<1x128x128xf32>
    tpu.vector_store %arg5[%c0_8, %c0_9, %c0_10], %22 {strides = array<i32>} : memref<1x128x128xf32, #tpu.memory_space<vmem>>, vector<1x128x128xf32>,
    return
  }
  func.func @transform_0(%arg0: i32, %arg1: i32) -> (i32, i32, i32) {
    %c0_i32 = arith.constant 0 : i32
    %c0_i32_0 = arith.constant 0 : i32
    %c0_i32_1 = arith.constant 0 : i32
    return %arg0, %c0_i32, %c0_i32_0 : i32, i32, i32
  }
  func.func @transform_1(%arg0: i32, %arg1: i32) -> (i32, i32, i32) {
    %c0_i32 = arith.constant 0 : i32
    %c0_i32_0 = arith.constant 0 : i32
    %c0_i32_1 = arith.constant 0 : i32
    return %arg0, %c0_i32, %c0_i32_0 : i32, i32, i32
  }
  func.func @transform_2(%arg0: i32, %arg1: i32) -> (i32, i32, i32) {
    %c0_i32 = arith.constant 0 : i32
    %c0_i32_0 = arith.constant 0 : i32
    %c0_i32_1 = arith.constant 0 : i32
    return %arg0, %c0_i32, %c0_i32_0 : i32, i32, i32
  }
  func.func @transform_3(%arg0: i32, %arg1: i32) -> (i32, i32, i32) {
    %c0_i32 = arith.constant 0 : i32
    %c0_i32_0 = arith.constant 0 : i32
    return %arg0, %arg1, %c0_i32 : i32, i32, i32
  }
}

module attributes {stable_mosaic.version = 11 : i64} {
  func.func @_variance_predictor_kernel(%arg0: i32, %arg1: memref<2x16x128xf32, #tpu.memory_space<vmem>>, %arg2: memref<3x128x128xf32, #tpu.memory_space<vmem>>, %arg3: memref<1x128xf32, #tpu.memory_space<vmem>>, %arg4: memref<1x128xf32, #tpu.memory_space<vmem>>, %arg5: memref<1x128xf32, #tpu.memory_space<vmem>>, %arg6: memref<3x128x128xf32, #tpu.memory_space<vmem>>, %arg7: memref<1x128xf32, #tpu.memory_space<vmem>>, %arg8: memref<1x128xf32, #tpu.memory_space<vmem>>, %arg9: memref<1x128xf32, #tpu.memory_space<vmem>>, %arg10: memref<1x128xf32, #tpu.memory_space<vmem>>, %arg11: memref<1x1xf32, #tpu.memory_space<vmem>>, %arg12: memref<2x1x16xi32, #tpu.memory_space<vmem>>, %arg13: memref<2x1x16xi32, #tpu.memory_space<vmem>>) attributes {dimension_semantics = [#tpu.dimension_semantics<parallel>], iteration_bounds = array<i64: 1>, scalar_prefetch = 0 : i64, scratch_operands = 0 : i64, tpu.core_type = #tpu.core_type<tc>, window_params = [{transform_indices = @transform_0, window_bounds = array<i64: 2, 16, 128>}, {pipeline_mode = #tpu.pipeline_mode<synchronous>, transform_indices = @transform_1, window_bounds = array<i64: 3, 128, 128>}, {pipeline_mode = #tpu.pipeline_mode<synchronous>, transform_indices = @transform_2, window_bounds = array<i64: 1, 128>}, {pipeline_mode = #tpu.pipeline_mode<synchronous>, transform_indices = @transform_3, window_bounds = array<i64: 1, 128>}, {pipeline_mode = #tpu.pipeline_mode<synchronous>, transform_indices = @transform_4, window_bounds = array<i64: 1, 128>}, {pipeline_mode = #tpu.pipeline_mode<synchronous>, transform_indices = @transform_5, window_bounds = array<i64: 3, 128, 128>}, {pipeline_mode = #tpu.pipeline_mode<synchronous>, transform_indices = @transform_6, window_bounds = array<i64: 1, 128>}, {pipeline_mode = #tpu.pipeline_mode<synchronous>, transform_indices = @transform_7, window_bounds = array<i64: 1, 128>}, {pipeline_mode = #tpu.pipeline_mode<synchronous>, transform_indices = @transform_8, window_bounds = array<i64: 1, 128>}, {pipeline_mode = #tpu.pipeline_mode<synchronous>, transform_indices = @transform_9, window_bounds = array<i64: 1, 128>}, {pipeline_mode = #tpu.pipeline_mode<synchronous>, transform_indices = @transform_10, window_bounds = array<i64: 1, 1>}, {transform_indices = @transform_11, window_bounds = array<i64: 2, 1, 16>}, {transform_indices = @transform_12, window_bounds = array<i64: 2, 1, 16>}]} {
    %c0 = arith.constant 0 : index
    %c0_0 = arith.constant 0 : index
    %c0_1 = arith.constant 0 : index
    %0 = vector.load %arg1[%c0, %c0_0, %c0_1] : memref<2x16x128xf32, #tpu.memory_space<vmem>>, vector<2x16x128xf32>
    %cst = arith.constant 0.000000e+00 : f32
    %1 = vector.broadcast %cst : f32 to vector<2x1x128xf32>
    %cst_2 = arith.constant 0.000000e+00 : f32
    %2 = vector.broadcast %cst_2 : f32 to vector<2x1x128xf32>
    %3 = tpu.concatenate %1, %0, %2 in 1 : vector<2x1x128xf32>, vector<2x16x128xf32>, vector<2x1x128xf32> -> vector<2x18x128xf32>
    %4 = vector.extract_strided_slice %3 {offsets = [0, 0, 0], sizes = [2, 16, 128], strides = [1, 1, 1]} : vector<2x18x128xf32> to vector<2x16x128xf32>
    %5 = vector.extract_strided_slice %3 {offsets = [0, 1, 0], sizes = [2, 16, 128], strides = [1, 1, 1]} : vector<2x18x128xf32> to vector<2x16x128xf32>
    %6 = vector.extract_strided_slice %3 {offsets = [0, 2, 0], sizes = [2, 16, 128], strides = [1, 1, 1]} : vector<2x18x128xf32> to vector<2x16x128xf32>
    %7 = tpu.concatenate %4, %5, %6 in 2 : vector<2x16x128xf32>, vector<2x16x128xf32>, vector<2x16x128xf32> -> vector<2x16x384xf32>
    %8 = vector.shape_cast %7 : vector<2x16x384xf32> to vector<32x384xf32>
    %c0_3 = arith.constant 0 : index
    %c0_4 = arith.constant 0 : index
    %c0_5 = arith.constant 0 : index
    %9 = vector.load %arg2[%c0_3, %c0_4, %c0_5] : memref<3x128x128xf32, #tpu.memory_space<vmem>>, vector<3x128x128xf32>
    %10 = vector.shape_cast %9 : vector<3x128x128xf32> to vector<384x128xf32>
    %11 = arith.truncf %8 : vector<32x384xf32> to vector<32x384xbf16>
    %12 = arith.truncf %10 : vector<384x128xf32> to vector<384x128xbf16>
    %cst_6 = arith.constant dense<0.000000e+00> : vector<32x128xf32>
    %13 = tpu.matmul %11, %12, %cst_6 {dimension_numbers = #tpu.dot_dimension_numbers<[1], [0], [0], [1], [0, 0, 1, 1], [], []>} : vector<32x384xbf16>, vector<384x128xbf16>, vector<32x128xf32> -> vector<32x128xf32>
    %c0_7 = arith.constant 0 : index
    %c0_8 = arith.constant 0 : index
    %14 = vector.load %arg3[%c0_7, %c0_8] : memref<1x128xf32, #tpu.memory_space<vmem>>, vector<1x128xf32>
    %15 = vector.broadcast %14 : vector<1x128xf32> to vector<32x128xf32>
    %16 = arith.addf %13, %15 : vector<32x128xf32>
    %cst_9 = arith.constant 0.000000e+00 : f32
    %17 = vector.broadcast %cst_9 : f32 to vector<32x128xf32>
    %18 = arith.maximumf %16, %17 : vector<32x128xf32>
    %cst_10 = arith.constant dense<0.000000e+00> : vector<32xf32>
    %19 = vector.multi_reduction <add>, %18, %cst_10 [1] : vector<32x128xf32> to vector<32xf32>
    %20 = vector.shape_cast %19 : vector<32xf32> to vector<32x1xf32>
    %cst_11 = arith.constant 1.280000e+02 : f32
    %21 = vector.broadcast %cst_11 : f32 to vector<32x1xf32>
    %22 = arith.divf %20, %21 : vector<32x1xf32>
    %23 = vector.broadcast %22 : vector<32x1xf32> to vector<32x128xf32>
    %24 = arith.subf %18, %23 : vector<32x128xf32>
    %25 = arith.mulf %24, %24 : vector<32x128xf32>
    %cst_12 = arith.constant dense<0.000000e+00> : vector<32xf32>
    %26 = vector.multi_reduction <add>, %25, %cst_12 [1] : vector<32x128xf32> to vector<32xf32>
    %27 = vector.shape_cast %26 : vector<32xf32> to vector<32x1xf32>
    %cst_13 = arith.constant 1.280000e+02 : f32
    %28 = vector.broadcast %cst_13 : f32 to vector<32x1xf32>
    %29 = arith.divf %27, %28 : vector<32x1xf32>
    %30 = vector.broadcast %22 : vector<32x1xf32> to vector<32x128xf32>
    %31 = arith.subf %18, %30 : vector<32x128xf32>
    %cst_14 = arith.constant 9.99999974E-6 : f32
    %32 = vector.broadcast %cst_14 : f32 to vector<32x1xf32>
    %33 = arith.addf %29, %32 : vector<32x1xf32>
    %34 = math.rsqrt %33 : vector<32x1xf32>
    %35 = vector.broadcast %34 : vector<32x1xf32> to vector<32x128xf32>
    %36 = arith.mulf %31, %35 : vector<32x128xf32>
    %c0_15 = arith.constant 0 : index
    %c0_16 = arith.constant 0 : index
    %37 = vector.load %arg4[%c0_15, %c0_16] : memref<1x128xf32, #tpu.memory_space<vmem>>, vector<1x128xf32>
    %38 = vector.broadcast %37 : vector<1x128xf32> to vector<32x128xf32>
    %39 = arith.mulf %36, %38 : vector<32x128xf32>
    %c0_17 = arith.constant 0 : index
    %c0_18 = arith.constant 0 : index
    %40 = vector.load %arg5[%c0_17, %c0_18] : memref<1x128xf32, #tpu.memory_space<vmem>>, vector<1x128xf32>
    %41 = vector.broadcast %40 : vector<1x128xf32> to vector<32x128xf32>
    %42 = arith.addf %39, %41 : vector<32x128xf32>
    %43 = vector.shape_cast %42 : vector<32x128xf32> to vector<2x16x128xf32>
    %cst_19 = arith.constant 0.000000e+00 : f32
    %44 = vector.broadcast %cst_19 : f32 to vector<2x1x128xf32>
    %cst_20 = arith.constant 0.000000e+00 : f32
    %45 = vector.broadcast %cst_20 : f32 to vector<2x1x128xf32>
    %46 = tpu.concatenate %44, %43, %45 in 1 : vector<2x1x128xf32>, vector<2x16x128xf32>, vector<2x1x128xf32> -> vector<2x18x128xf32>
    %47 = vector.extract_strided_slice %46 {offsets = [0, 0, 0], sizes = [2, 16, 128], strides = [1, 1, 1]} : vector<2x18x128xf32> to vector<2x16x128xf32>
    %48 = vector.extract_strided_slice %46 {offsets = [0, 1, 0], sizes = [2, 16, 128], strides = [1, 1, 1]} : vector<2x18x128xf32> to vector<2x16x128xf32>
    %49 = vector.extract_strided_slice %46 {offsets = [0, 2, 0], sizes = [2, 16, 128], strides = [1, 1, 1]} : vector<2x18x128xf32> to vector<2x16x128xf32>
    %50 = tpu.concatenate %47, %48, %49 in 2 : vector<2x16x128xf32>, vector<2x16x128xf32>, vector<2x16x128xf32> -> vector<2x16x384xf32>
    %51 = vector.shape_cast %50 : vector<2x16x384xf32> to vector<32x384xf32>
    %c0_21 = arith.constant 0 : index
    %c0_22 = arith.constant 0 : index
    %c0_23 = arith.constant 0 : index
    %52 = vector.load %arg6[%c0_21, %c0_22, %c0_23] : memref<3x128x128xf32, #tpu.memory_space<vmem>>, vector<3x128x128xf32>
    %53 = vector.shape_cast %52 : vector<3x128x128xf32> to vector<384x128xf32>
    %54 = arith.truncf %51 : vector<32x384xf32> to vector<32x384xbf16>
    %55 = arith.truncf %53 : vector<384x128xf32> to vector<384x128xbf16>
    %cst_24 = arith.constant dense<0.000000e+00> : vector<32x128xf32>
    %56 = tpu.matmul %54, %55, %cst_24 {dimension_numbers = #tpu.dot_dimension_numbers<[1], [0], [0], [1], [0, 0, 1, 1], [], []>} : vector<32x384xbf16>, vector<384x128xbf16>, vector<32x128xf32> -> vector<32x128xf32>
    %c0_25 = arith.constant 0 : index
    %c0_26 = arith.constant 0 : index
    %57 = vector.load %arg7[%c0_25, %c0_26] : memref<1x128xf32, #tpu.memory_space<vmem>>, vector<1x128xf32>
    %58 = vector.broadcast %57 : vector<1x128xf32> to vector<32x128xf32>
    %59 = arith.addf %56, %58 : vector<32x128xf32>
    %cst_27 = arith.constant 0.000000e+00 : f32
    %60 = vector.broadcast %cst_27 : f32 to vector<32x128xf32>
    %61 = arith.maximumf %59, %60 : vector<32x128xf32>
    %cst_28 = arith.constant dense<0.000000e+00> : vector<32xf32>
    %62 = vector.multi_reduction <add>, %61, %cst_28 [1] : vector<32x128xf32> to vector<32xf32>
    %63 = vector.shape_cast %62 : vector<32xf32> to vector<32x1xf32>
    %cst_29 = arith.constant 1.280000e+02 : f32
    %64 = vector.broadcast %cst_29 : f32 to vector<32x1xf32>
    %65 = arith.divf %63, %64 : vector<32x1xf32>
    %66 = vector.broadcast %65 : vector<32x1xf32> to vector<32x128xf32>
    %67 = arith.subf %61, %66 : vector<32x128xf32>
    %68 = arith.mulf %67, %67 : vector<32x128xf32>
    %cst_30 = arith.constant dense<0.000000e+00> : vector<32xf32>
    %69 = vector.multi_reduction <add>, %68, %cst_30 [1] : vector<32x128xf32> to vector<32xf32>
    %70 = vector.shape_cast %69 : vector<32xf32> to vector<32x1xf32>
    %cst_31 = arith.constant 1.280000e+02 : f32
    %71 = vector.broadcast %cst_31 : f32 to vector<32x1xf32>
    %72 = arith.divf %70, %71 : vector<32x1xf32>
    %73 = vector.broadcast %65 : vector<32x1xf32> to vector<32x128xf32>
    %74 = arith.subf %61, %73 : vector<32x128xf32>
    %cst_32 = arith.constant 9.99999974E-6 : f32
    %75 = vector.broadcast %cst_32 : f32 to vector<32x1xf32>
    %76 = arith.addf %72, %75 : vector<32x1xf32>
    %77 = math.rsqrt %76 : vector<32x1xf32>
    %78 = vector.broadcast %77 : vector<32x1xf32> to vector<32x128xf32>
    %79 = arith.mulf %74, %78 : vector<32x128xf32>
    %c0_33 = arith.constant 0 : index
    %c0_34 = arith.constant 0 : index
    %80 = vector.load %arg8[%c0_33, %c0_34] : memref<1x128xf32, #tpu.memory_space<vmem>>, vector<1x128xf32>
    %81 = vector.broadcast %80 : vector<1x128xf32> to vector<32x128xf32>
    %82 = arith.mulf %79, %81 : vector<32x128xf32>
    %c0_35 = arith.constant 0 : index
    %c0_36 = arith.constant 0 : index
    %83 = vector.load %arg9[%c0_35, %c0_36] : memref<1x128xf32, #tpu.memory_space<vmem>>, vector<1x128xf32>
    %84 = vector.broadcast %83 : vector<1x128xf32> to vector<32x128xf32>
    %85 = arith.addf %82, %84 : vector<32x128xf32>
    %c0_37 = arith.constant 0 : index
    %c0_38 = arith.constant 0 : index
    %86 = vector.load %arg10[%c0_37, %c0_38] : memref<1x128xf32, #tpu.memory_space<vmem>>, vector<1x128xf32>
    %87 = vector.broadcast %86 : vector<1x128xf32> to vector<32x128xf32>
    %88 = arith.mulf %85, %87 : vector<32x128xf32>
    %89 = vector.shape_cast %88 : vector<32x128xf32> to vector<2x16x128xf32>
    %cst_39 = arith.constant dense<0.000000e+00> : vector<2x16xf32>
    %90 = vector.multi_reduction <add>, %89, %cst_39 [2] : vector<2x16x128xf32> to vector<2x16xf32>
    %c0_40 = arith.constant 0 : index
    %c0_41 = arith.constant 0 : index
    %91 = vector.load %arg11[%c0_40, %c0_41] : memref<1x1xf32, #tpu.memory_space<vmem>>, vector<1x1xf32>
    %92 = vector.broadcast %91 : vector<1x1xf32> to vector<2x16xf32>
    %93 = arith.addf %90, %92 : vector<2x16xf32>
    %94 = math.exp %93 : vector<2x16xf32>
    %cst_42 = arith.constant 1.000000e+00 : f32
    %95 = vector.broadcast %cst_42 : f32 to vector<2x16xf32>
    %96 = arith.subf %94, %95 : vector<2x16xf32>
    %cst_43 = arith.constant 1.000000e+00 : f32
    %97 = vector.broadcast %cst_43 : f32 to vector<2x16xf32>
    %98 = arith.mulf %96, %97 : vector<2x16xf32>
    %cst_44 = arith.constant 5.000000e-01 : f32
    %99 = vector.broadcast %cst_44 : f32 to vector<2x16xf32>
    %100 = arith.addf %98, %99 : vector<2x16xf32>
    %101 = math.floor %100 : vector<2x16xf32>
    %cst_45 = arith.constant 0.000000e+00 : f32
    %102 = vector.broadcast %cst_45 : f32 to vector<2x16xf32>
    %103 = arith.maximumf %101, %102 : vector<2x16xf32>
    %104 = arith.fptosi %103 : vector<2x16xf32> to vector<2x16xi32>
    %105 = tpu.iota {dimensions = array<i32: 0>} : vector<16x16xi32>
    %106 = tpu.iota {dimensions = array<i32: 1>} : vector<16x16xi32>
    %107 = arith.cmpi sle, %105, %106 : vector<16x16xi32>
    %108 = arith.extui %107 : vector<16x16xi1> to vector<16x16xi32>
    %109 = arith.sitofp %108 : vector<16x16xi32> to vector<16x16xf32>
    %cst_46 = arith.constant dense<0.000000e+00> : vector<2x16xf32>
    %110 = tpu.matmul %103, %109, %cst_46 {dimension_numbers = #tpu.dot_dimension_numbers<[1], [0], [0], [1], [0, 0, 1, 1], [], []>} : vector<2x16xf32>, vector<16x16xf32>, vector<2x16xf32> -> vector<2x16xf32>
    %111 = arith.fptosi %110 : vector<2x16xf32> to vector<2x16xi32>
    %112 = arith.subi %111, %104 : vector<2x16xi32>
    %c0_47 = arith.constant 0 : index
    %c0_48 = arith.constant 0 : index
    %c0_49 = arith.constant 0 : index
    %113 = vector.load %arg12[%c0_47, %c0_48, %c0_49] : memref<2x1x16xi32, #tpu.memory_space<vmem>>, vector<2x1x16xi32>
    %114 = vector.shape_cast %113 : vector<2x1x16xi32> to vector<2x16xi32>
    %115 = vector.shape_cast %112 : vector<2x16xi32> to vector<2x1x16xi32>
    tpu.vector_store %arg12[%c0_47, %c0_48, %c0_49], %115 {strides = array<i32>} : memref<2x1x16xi32, #tpu.memory_space<vmem>>, vector<2x1x16xi32>,
    %c0_50 = arith.constant 0 : index
    %c0_51 = arith.constant 0 : index
    %c0_52 = arith.constant 0 : index
    %116 = vector.load %arg13[%c0_50, %c0_51, %c0_52] : memref<2x1x16xi32, #tpu.memory_space<vmem>>, vector<2x1x16xi32>
    %117 = vector.shape_cast %116 : vector<2x1x16xi32> to vector<2x16xi32>
    %118 = vector.shape_cast %111 : vector<2x16xi32> to vector<2x1x16xi32>
    tpu.vector_store %arg13[%c0_50, %c0_51, %c0_52], %118 {strides = array<i32>} : memref<2x1x16xi32, #tpu.memory_space<vmem>>, vector<2x1x16xi32>,
    return
  }
  func.func @transform_0(%arg0: i32) -> (i32, i32, i32) {
    %c0_i32 = arith.constant 0 : i32
    %c0_i32_0 = arith.constant 0 : i32
    %c0_i32_1 = arith.constant 0 : i32
    return %arg0, %c0_i32, %c0_i32_0 : i32, i32, i32
  }
  func.func @transform_1(%arg0: i32) -> (i32, i32, i32) {
    %c0_i32 = arith.constant 0 : i32
    %c0_i32_0 = arith.constant 0 : i32
    %c0_i32_1 = arith.constant 0 : i32
    %c0_i32_2 = arith.constant 0 : i32
    return %c0_i32, %c0_i32_0, %c0_i32_1 : i32, i32, i32
  }
  func.func @transform_2(%arg0: i32) -> (i32, i32) {
    %c0_i32 = arith.constant 0 : i32
    %c0_i32_0 = arith.constant 0 : i32
    %c0_i32_1 = arith.constant 0 : i32
    return %c0_i32, %c0_i32_0 : i32, i32
  }
  func.func @transform_3(%arg0: i32) -> (i32, i32) {
    %c0_i32 = arith.constant 0 : i32
    %c0_i32_0 = arith.constant 0 : i32
    %c0_i32_1 = arith.constant 0 : i32
    return %c0_i32, %c0_i32_0 : i32, i32
  }
  func.func @transform_4(%arg0: i32) -> (i32, i32) {
    %c0_i32 = arith.constant 0 : i32
    %c0_i32_0 = arith.constant 0 : i32
    %c0_i32_1 = arith.constant 0 : i32
    return %c0_i32, %c0_i32_0 : i32, i32
  }
  func.func @transform_5(%arg0: i32) -> (i32, i32, i32) {
    %c0_i32 = arith.constant 0 : i32
    %c0_i32_0 = arith.constant 0 : i32
    %c0_i32_1 = arith.constant 0 : i32
    %c0_i32_2 = arith.constant 0 : i32
    return %c0_i32, %c0_i32_0, %c0_i32_1 : i32, i32, i32
  }
  func.func @transform_6(%arg0: i32) -> (i32, i32) {
    %c0_i32 = arith.constant 0 : i32
    %c0_i32_0 = arith.constant 0 : i32
    %c0_i32_1 = arith.constant 0 : i32
    return %c0_i32, %c0_i32_0 : i32, i32
  }
  func.func @transform_7(%arg0: i32) -> (i32, i32) {
    %c0_i32 = arith.constant 0 : i32
    %c0_i32_0 = arith.constant 0 : i32
    %c0_i32_1 = arith.constant 0 : i32
    return %c0_i32, %c0_i32_0 : i32, i32
  }
  func.func @transform_8(%arg0: i32) -> (i32, i32) {
    %c0_i32 = arith.constant 0 : i32
    %c0_i32_0 = arith.constant 0 : i32
    %c0_i32_1 = arith.constant 0 : i32
    return %c0_i32, %c0_i32_0 : i32, i32
  }
  func.func @transform_9(%arg0: i32) -> (i32, i32) {
    %c0_i32 = arith.constant 0 : i32
    %c0_i32_0 = arith.constant 0 : i32
    %c0_i32_1 = arith.constant 0 : i32
    return %c0_i32, %c0_i32_0 : i32, i32
  }
  func.func @transform_10(%arg0: i32) -> (i32, i32) {
    %c0_i32 = arith.constant 0 : i32
    %c0_i32_0 = arith.constant 0 : i32
    %c0_i32_1 = arith.constant 0 : i32
    return %c0_i32, %c0_i32_0 : i32, i32
  }
  func.func @transform_11(%arg0: i32) -> (i32, i32, i32) {
    %c0_i32 = arith.constant 0 : i32
    %c0_i32_0 = arith.constant 0 : i32
    %c0_i32_1 = arith.constant 0 : i32
    return %arg0, %c0_i32, %c0_i32_0 : i32, i32, i32
  }
  func.func @transform_12(%arg0: i32) -> (i32, i32, i32) {
    %c0_i32 = arith.constant 0 : i32
    %c0_i32_0 = arith.constant 0 : i32
    %c0_i32_1 = arith.constant 0 : i32
    return %arg0, %c0_i32, %c0_i32_0 : i32, i32, i32
  }
}

</mosaic_0001>

<bundles_post_ra>
// kernel: length_regulator_forward.3
= control target key start
LH: loop header
LB: loop body
LE: loop exit
PB: predicated region body
PF: predicated region fallthrough
CT: control target
= control target key end

     0   :  { %8 = vsyncpa [#allocation3], 0  ;;  %s1127_s0 = inlined_call_operand.vmem [shape: f32[2,16,128], index: 0, kind: input, shape index: {}]   ;;  %s1128_s1 = inlined_call_operand.vmem [shape: s32[2,1,16], index: 1, kind: input, shape index: {}]   ;;  %s1129_s2 = inlined_call_operand.vmem [shape: s32[2,1,16], index: 2, kind: input, shape index: {}]   ;;  %s1130_s3 = inlined_call_operand.hbm [shape: f32[2,512,128], index: 3, kind: output, shape index: {}]  }
   0x1   :  { %10 = vsyncpa [#allocation3 + $0x1], 0  ;;  %s860_s12 = smov 0   ;;  %s862_s13 = smov 0  }
   0x2   :  { %s864_s14 = smov 0   ;;  %s866_s15 = smov 0  }
   0x3   :  { %s868_s16 = smov 0   ;;  %s870_s17 = smov 0  }
   0x4   :  { %s872_s18 = smov 0   ;;  %s874_s19 = smov 0  }
   0x5 LB: > { %s597_s20 = sadd.s32 4294967295, %s834_s19   ;;  %s598_s21 = sadd.s32 4294967294, %s834_s19   ;;  %s834_s19 = sphi %s874_s19, %s16_s19   ;;  %s830_s18 = sphi %s872_s18, %s1139_s18   ;;  %s826_s17 = sphi %s870_s17, %s1138_s17   ;;  %s822_s16 = sphi %s868_s16, %s1137_s16   ;;  %s818_s15 = sphi %s866_s15, %s1136_s15   ;;  %s814_s14 = sphi %s864_s14, %s1135_s14   ;;  %s810_s13 = sphi %s862_s13, %s1134_s13   ;;  %s806_s12 = sphi %s860_s12, %s1133_s12  }
   0x6   : > { %s25_s22 = sadd.s32 1, %s826_s17  ;;  %s28_s23 = sadd.s32 1, %s830_s18 }
   0x7   : > { %p26_p0 = scmp.ge.s32.totalorder %s25_s22, 4  ;;  %p125_p1 = scmp.ne.s32.totalorder %s814_s14, %s810_s13 }
   0x8   : > { %p126_p2 = scmp.eq.s32.totalorder %s597_s20, 7  ;;  %p131_p5 = scmp.ne.s32.totalorder %s810_s13, %s806_s12 }
   0x9   : > { %s1141_s22 = smov (%p26_p0, %s25_s22), 0  ;;  %s1143_s23 = smov (!%p26_p0, %s28_s23), %s830_s18 }
   0xa   : > { %s111_s24 = ssub.s32 %s826_s17, %s1141_s22  ;;  %p911_p3 = por %p126_p2, %p125_p1 }
   0xb   : > { %p30_p4 = scmp.ge.s32.totalorder %s1143_s23, 2  ;;  %p132_p6 = scmp.eq.s32.totalorder %s598_s21, 7 }
   0xc   : > { %p601_p7 = scmp.ge.s32.totalorder %s834_s19, 1  ;;  %p170_p9 = scmp.lt.s32.totalorder %s834_s19, 9 }
   0xd   : > { %s1145_s23 = smov (%p30_p4, %s1143_s23), 0  ;;  %p920_p8 = por %p132_p6, %p131_p5 }
   0xe   : > { %s110_s27 = ssub.s32 %s830_s18, %s1145_s23  ;;  %s115_s28 = sadd.s32 1, %s814_s14 }
   0xf   : > { %s112_s29 = sor.u32 %s111_s24, %s110_s27  ;;  %p171_p10 = pnand %p601_p7, %p170_p9 }
  0x10   : > { %p113_p11 = scmp.eq.s32.totalorder %s112_s29, 0  ;;  %p200_p12 = scmp.lt.s32.totalorder (!%p171_p10), %s822_s16, 1 }
  0x11   : > { %174 = sbr.rel (%p171_p10) target bundleno = 265 (0x109), region = 32  ;;  %s605_s4 = sshll.u32 (!%p171_p10), %s818_s15, 7 }
  0x12   : > { %s929_s30 = scalar_select %p113_p11, %s814_s14, %s115_s28  }
  0x13   : > { %s197_s28 = sand.u32 (!%p171_p10), 1, %s810_s13   ;;  %s837_s21 = smov (!%p171_p10), [#allocation2]  }
  0x14   : > { %s602_s29 = sshll.u32 (!%p171_p10), %s197_s28, 7  ;;  %s1076_s11 = scalar_lea.sflag (!%p171_p10), [#allocation3], %s197_s28 }
  0x15   : > { %s746_s24 = sshll.u32 (!%p171_p10), %s837_s21, 4  ;;  %s747_s24 = int_to_ptr.vmem [resolvable:$false] %s746_s24 }
  0x16   : > { %v214_v0 = vlaneseq  ;;  %v933_v1 = vstv %s605_s4  ;;  %s201_s5 = scalar_select %p200_p12, %s822_s16, 1  ;;  %vm349_vm0 = vcmask 130048   ;;  %v836_v21 = vmov 0.0  }
  0x17   : > { %s1046_s4 = scalar_lea.vmem [#allocation2], %s602_s29 }
  0x18   : > { %v936_v2 = vshrl.u32 %v214_v0, 7  ;;  %s638_s6 = sshll.u32 %s201_s5, 4  ;;  %s207_s9 = scalar_lea.vmem %s1128_s1, %s201_s5 }
  0x19   : > { %s204_s20 = scalar_lea.vmem %s1127_s0, %s638_s6  ;;  %s210_s27 = scalar_lea.vmem %s1129_s2, %s201_s5  ;;  %v952_v7 = vld [vmem:[%s207_s9] ss:$0 sm:$0xff] }
  0x1a   : > { %v216_v3 = vadd.s32 8, %v936_v2  ;;  %v232_v4 = vadd.s32 %v933_v1, %v936_v2  ;;  %v223_v5 = vadd.s32 64, %v936_v2  ;;  %v224_v6 = vadd.s32 72, %v936_v2  ;;  %v958_v12 = vld [vmem:[%s210_s27] ss:$0 sm:$0xff]  ;;  %v347_v14 = vld [vmem:[%s204_s20 + $0x8] sm:$0xff] }
  0x1b   : > { %v217_v8 = vadd.s32 16, %v936_v2  ;;  %v218_v9 = vadd.s32 24, %v936_v2  ;;  %v225_v10 = vadd.s32 80, %v936_v2  ;;  %v226_v11 = vadd.s32 88, %v936_v2  ;;  %v346_v13 = vld [vmem:[%s204_s20] sm:$0xff]  ;;  %s633_s5 = sshll.u32 %s818_s15, 4 }
  0x1c   : > { %v233_v15 = vadd.s32 %v933_v1, %v216_v3  ;;  %vm254_vm1 = vcmp.ge.s32.totalorder %v232_v4, %v952_v7  ;;  %v240_v16 = vadd.s32 %v933_v1, %v223_v5  ;;  %v241_v17 = vadd.s32 %v933_v1, %v224_v6  ;;  %s634_s6 = sshll.u32 %s822_s16, 6  ;;  %s503_s9 = sshll.u32 %s1046_s4, 4  ;;  %s1069_s9 = int_to_ptr.vmem [resolvable:$true] %s503_s9 }
  0x1d   : > { %v348_v18 = vpack.c.bf16 %v347_v14, %v346_v13  ;;  %vm274_vm2 = vcmp.lt.s32.totalorder %v232_v4, %v958_v12  ;;  %v234_v19 = vadd.s32 %v933_v1, %v217_v8  ;;  %v235_v20 = vadd.s32 %v933_v1, %v218_v9  ;;  %s500_s7 = sadd.s32 %s634_s6, %s633_s5  ;;  %s742_s20 = scalar_lea.vmem %s1069_s9, 2048 }
  0x1e   : > { %vm255_vm3 = vcmp.ge.s32.totalorder %v233_v15, %v952_v7  ;;  %vm275_vm4 = vcmp.lt.s32.totalorder %v233_v15, %v958_v12  ;;  %vm290_vm5 = vmand %vm254_vm1, %vm274_vm2  ;;  %vm262_vm6 = vcmp.ge.s32.totalorder %v240_v16, %v952_v7  ;;  %vm263_vm7 = vcmp.ge.s32.totalorder %v241_v17, %v952_v7  ;;  %s635_s8 = sshll.u32 %s500_s7, 7  ;;  %p743_p13 = scmp.ne.s32.totalorder %s1069_s9, %s742_s20 }
  0x1f   : > { %648 = vmatprep.subr.bf16.mxu0 %v348_v18  ;;  %666 = vmatprep.subr.bf16.mxu1 %v348_v18  ;;  %vm291_vm8 = vmand %vm255_vm3, %vm275_vm4  ;;  %v608_v22 = vsel %vm290_vm5, 1.0, %v836_v21  ;;  %vm282_vm9 = vcmp.lt.s32.totalorder %v240_v16, %v958_v12  ;;  %vm283_vm10 = vcmp.lt.s32.totalorder %v241_v17, %v958_v12  ;;  %vm256_vm11 = vcmp.ge.s32.totalorder %v234_v19, %v952_v7  ;;  %s1067_s10 = scalar_lea.hbm %s1130_s3, %s635_s8  ;;  %s748_s27 = scalar_lea.vmem %s747_s24, 4096 }
  0x20   : > { %649 = vmatpush3.bf16.msra.mxu0 %v348_v18  ;;  %667 = vmatpush3.bf16.msra.mxu1 %v348_v18  ;;  %v609_v23 = vsel %vm291_vm8, 1.0, %v836_v21  ;;  %vm298_vm12 = vmand %vm262_vm6, %vm282_vm9  ;;  %vm257_vm13 = vcmp.ge.s32.totalorder %v235_v20, %v952_v7  ;;  %vm276_vm14 = vcmp.lt.s32.totalorder %v234_v19, %v958_v12  ;;  %vm277_vm15 = vcmp.lt.s32.totalorder %v235_v20, %v958_v12  ;;  %p744_p0 = pnand %p743_p13, %p911_p3  ;;  %p749_p2 = scmp.lt.s32.totalorder %s1069_s9, %s747_s24 }
  0x21   : > { %v338_v24 = vpack.c.bf16 %v609_v23, %v608_v22  ;;  %vm299_vm1 = vmand %vm263_vm7, %vm283_vm10  ;;  %v616_v25 = vsel %vm298_vm12, 1.0, %v836_v21  ;;  %v242_v26 = vadd.s32 %v933_v1, %v225_v10  ;;  %v243_v27 = vadd.s32 %v933_v1, %v226_v11  ;;  %p750_p4 = scmp.lt.s32.totalorder %s748_s27, %s742_s20 }
  0x22   : > { %v617_v28 = vsel %vm299_vm1, 1.0, %v836_v21  ;;  %vm292_vm2 = vmand %vm256_vm11, %vm276_vm14  ;;  %v219_v29 = vadd.s32 32, %v936_v2  ;;  %v220_v30 = vadd.s32 40, %v936_v2  ;;  %v227_v31 = vadd.s32 96, %v936_v2  ;;  %p745_p1 = pneg %p744_p0 }
  0x23   : > { %650 = vmatprep.mubr.msk.bf16.mxu0 %vm349_vm0, %v338_v24  ;;  %v342_v32 = vpack.c.bf16 %v617_v28, %v616_v25  ;;  %vm293_vm3 = vmand %vm257_vm13, %vm277_vm15  ;;  %v610_v33 = vsel %vm292_vm2, 1.0, %v836_v21  ;;  %vm264_vm4 = vcmp.ge.s32.totalorder %v242_v26, %v952_v7  ;;  %vm265_vm5 = vcmp.ge.s32.totalorder %v243_v27, %v952_v7  ;;  %p751_p5 = por %p750_p4, %p749_p2 }
  0x24   : > { %v611_v34 = vsel %vm293_vm3, 1.0, %v836_v21  ;;  %vm284_vm6 = vcmp.lt.s32.totalorder %v242_v26, %v958_v12  ;;  %vm285_vm7 = vcmp.lt.s32.totalorder %v243_v27, %v958_v12  ;;  %v236_v35 = vadd.s32 %v933_v1, %v219_v29 }
  0x25   : > { %658 = vmatprep.mubr.msk.bf16.mxu1 %vm349_vm0, %v342_v32  ;;  %v339_v36 = vpack.c.bf16 %v611_v34, %v610_v33  ;;  %vm300_vm8 = vmand %vm264_vm4, %vm284_vm6  ;;  %v237_v37 = vadd.s32 %v933_v1, %v220_v30  ;;  %v228_v38 = vadd.s32 104, %v936_v2  ;;  %v244_v39 = vadd.s32 %v933_v1, %v227_v31  ;;  %p752_p6 = pnand %p751_p5, %p745_p1 }
  0x26   : > { %vm301_vm9 = vmand %vm265_vm5, %vm285_vm7  ;;  %v618_v40 = vsel %vm300_vm8, 1.0, %v836_v21  ;;  %vm258_vm10 = vcmp.ge.s32.totalorder %v236_v35, %v952_v7  ;;  %vm278_vm11 = vcmp.lt.s32.totalorder %v236_v35, %v958_v12  ;;  %v221_v41 = vadd.s32 48, %v936_v2 }
  0x27   : > { %651 = vmatmul.mubr.msk.bf16.vlgmr.msra.gmra.mxu0 %vm349_vm0, %v339_v36  ;;  %v619_v42 = vsel %vm301_vm9, 1.0, %v836_v21  ;;  %vm259_vm12 = vcmp.ge.s32.totalorder %v237_v37, %v952_v7  ;;  %vm279_vm13 = vcmp.lt.s32.totalorder %v237_v37, %v958_v12  ;;  %vm294_vm14 = vmand %vm258_vm10, %vm278_vm11  ;;  %v245_v43 = vadd.s32 %v933_v1, %v228_v38 }
  0x28   : > { %v343_v44 = vpack.c.bf16 %v619_v42, %v618_v40  ;;  %vm295_vm15 = vmand %vm259_vm12, %vm279_vm13  ;;  %v612_v45 = vsel %vm294_vm14, 1.0, %v836_v21  ;;  %vm266_vm1 = vcmp.ge.s32.totalorder %v244_v39, %v952_v7  ;;  %vm286_vm2 = vcmp.lt.s32.totalorder %v244_v39, %v958_v12 }
  0x29   : > { %v613_v46 = vsel %vm295_vm15, 1.0, %v836_v21  ;;  %vm267_vm3 = vcmp.ge.s32.totalorder %v245_v43, %v952_v7  ;;  %vm287_vm4 = vcmp.lt.s32.totalorder %v245_v43, %v958_v12  ;;  %vm302_vm5 = vmand %vm266_vm1, %vm286_vm2  ;;  %v222_v47 = vadd.s32 56, %v936_v2 }
  0x2a   : > { %659 = vmatmul.mubr.msk.bf16.vlgmr.msra.gmra.mxu1 %vm349_vm0, %v343_v44  ;;  %v340_v48 = vpack.c.bf16 %v613_v46, %v612_v45  ;;  %vm303_vm6 = vmand %vm267_vm3, %vm287_vm4  ;;  %v620_v49 = vsel %vm302_vm5, 1.0, %v836_v21  ;;  %v238_v50 = vadd.s32 %v933_v1, %v221_v41  ;;  %v229_v51 = vadd.s32 112, %v936_v2 }
  0x2b   : > { %v621_v52 = vsel %vm303_vm6, 1.0, %v836_v21  ;;  %v239_v53 = vadd.s32 %v933_v1, %v222_v47  ;;  %v230_v54 = vadd.s32 120, %v936_v2 }
  0x2c   : > { %654 = vmatprep.mubr.msk.bf16.mxu0 %vm349_vm0, %v340_v48  ;;  %v344_v55 = vpack.c.bf16 %v621_v52, %v620_v49  ;;  %vm260_vm7 = vcmp.ge.s32.totalorder %v238_v50, %v952_v7  ;;  %vm280_vm8 = vcmp.lt.s32.totalorder %v238_v50, %v958_v12  ;;  %v246_v56 = vadd.s32 %v933_v1, %v229_v51 }
  0x2d   : > { %vm261_vm9 = vcmp.ge.s32.totalorder %v239_v53, %v952_v7  ;;  %vm281_vm10 = vcmp.lt.s32.totalorder %v239_v53, %v958_v12  ;;  %vm296_vm11 = vmand %vm260_vm7, %vm280_vm8  ;;  %v247_v57 = vadd.s32 %v933_v1, %v230_v54 }
  0x2e   : > { %662 = vmatprep.mubr.msk.bf16.mxu1 %vm349_vm0, %v344_v55  ;;  %vm297_vm12 = vmand %vm261_vm9, %vm281_vm10  ;;  %v614_v58 = vsel %vm296_vm11, 1.0, %v836_v21  ;;  %vm268_vm13 = vcmp.ge.s32.totalorder %v246_v56, %v952_v7  ;;  %vm288_vm14 = vcmp.lt.s32.totalorder %v246_v56, %v958_v12 }
  0x2f   : > { %v615_v59 = vsel %vm297_vm12, 1.0, %v836_v21  ;;  %vm269_vm15 = vcmp.ge.s32.totalorder %v247_v57, %v952_v7  ;;  %vm289_vm1 = vcmp.lt.s32.totalorder %v247_v57, %v958_v12  ;;  %vm304_vm2 = vmand %vm268_vm13, %vm288_vm14 }
  0x30   : > { %v341_v60 = vpack.c.bf16 %v615_v59, %v614_v58  ;;  %vm305_vm3 = vmand %vm269_vm15, %vm289_vm1  ;;  %v622_v61 = vsel %vm304_vm2, 1.0, %v836_v21 }
  0x31   : > { %v623_v62 = vsel %vm305_vm3, 1.0, %v836_v21 }
  0x32   : > { %655 = vmatmul.mubr.msk.bf16.gmra.mxu0 %vm349_vm0, %v341_v60  ;;  %v345_v63 = vpack.c.bf16 %v623_v62, %v622_v61 }
  0x34   : > { %663 = vmatmul.mubr.msk.bf16.gmra.mxu1 %vm349_vm0, %v345_v63 }
  0xe7   : > { %v652_v0 = vpop.f32.mrf.mxu0 }
  0xe8   : > { %473 = vst [vmem:[%s1046_s4 + $0x10] sm:$0xff] %v652_v0 }
  0xe9   : > { %v408_v1 = vpop.f32.mrf.mxu0 }
  0xea   : > { %v660_v2 = vpop.f32.mrf.mxu1  ;;  %471 = vst [vmem:[%s1046_s4] sm:$0xff] %v408_v1 }
  0xeb   : > { %481 = vst [vmem:[%s1046_s4 + $0x50] sm:$0xff] %v660_v2  ;;  %v653_v3 = vpop.f32.mrf.mxu0 }
  0xec   : > { %v440_v4 = vpop.f32.mrf.mxu1  ;;  %474 = vst [vmem:[%s1046_s4 + $0x18] sm:$0xff] %v653_v3 }
  0xed   : > { %479 = vst [vmem:[%s1046_s4 + $0x40] sm:$0xff] %v440_v4  ;;  %v411_v5 = vpop.f32.mrf.mxu0 }
  0xee   : > { %v661_v6 = vpop.f32.mrf.mxu1  ;;  %472 = vst [vmem:[%s1046_s4 + $0x8] sm:$0xff] %v411_v5 }
  0xef   : > { %482 = vst [vmem:[%s1046_s4 + $0x58] sm:$0xff] %v661_v6 }
  0xf0   : > { %v443_v7 = vpop.f32.mrf.mxu1 }
  0xf1   : > { %480 = vst [vmem:[%s1046_s4 + $0x48] sm:$0xff] %v443_v7 }
  0xf2   : > { %v656_v8 = vpop.f32.mrf.mxu0 }
  0xf3   : > { %477 = vst [vmem:[%s1046_s4 + $0x30] sm:$0xff] %v656_v8 }
  0xf4   : > { %v664_v9 = vpop.f32.mrf.mxu1  ;;  %v424_v10 = vpop.f32.mrf.mxu0 }
  0xf5   : > { %485 = vst [vmem:[%s1046_s4 + $0x70] sm:$0xff] %v664_v9  ;;  %475 = vst [vmem:[%s1046_s4 + $0x20] sm:$0xff] %v424_v10 }
  0xf6   : > { %v456_v11 = vpop.f32.mrf.mxu1  ;;  %v657_v12 = vpop.f32.mrf.mxu0 }
  0xf7   : > { %483 = vst [vmem:[%s1046_s4 + $0x60] sm:$0xff] %v456_v11  ;;  %478 = vst [vmem:[%s1046_s4 + $0x38] sm:$0xff] %v657_v12 }
  0xf8   : > { %v665_v13 = vpop.f32.mrf.mxu1  ;;  %v427_v14 = vpop.f32.mrf.mxu0 }
  0xf9   : > { %486 = vst [vmem:[%s1046_s4 + $0x78] sm:$0xff] %v665_v13  ;;  %476 = vst [vmem:[%s1046_s4 + $0x28] sm:$0xff] %v427_v14 }
  0xfa   : > { %v459_v15 = vpop.f32.mrf.mxu1 }
  0xfb   : > { %484 = vst [vmem:[%s1046_s4 + $0x68] sm:$0xff] %v459_v15 }
  0xfc   : > { %755 = shalt.err (!%p752_p6)
}
  0xfd   : > { %s756_s28 = scalar_lea.hbm %s1067_s10, 2048  ;;  %s760_s5 = scalar_lea.hbm %s1130_s3, 16384 }
  0xfe   : > { %p757_p7 = scmp.ne.s32.totalorder %s1067_s10, %s756_s28  ;;  %p761_p11 = scmp.lt.s32.totalorder %s1067_s10, %s1130_s3 }
  0xff   : > { %p762_p12 = scmp.lt.s32.totalorder %s760_s5, %s756_s28 }
 0x100   : > { %p758_p9 = pnand %p757_p7, %p911_p3 }
 0x101   : > { %p763_p13 = por %p762_p12, %p761_p11 }
 0x102   : > { %p759_p10 = pneg %p758_p9 }
 0x104   : > { %p764_p0 = pnand %p763_p13, %p759_p10 }
 0x106   : > { %767 = shalt.err (!%p764_p0)
}
 0x107   : > { %s838_s8 = smov 128   ;;  %s839_s15 = smov 8  }
 0x108   : > { %668 = dma.vmem_to_hbm [thread:$0]  (%p911_p3), %s1069_s9, 2048, %s1067_s10, %s1076_s11, %s838_s8, %s838_s8, %s839_s15  }
 0x109 PF: > { %p674_p1 = scmp.ge.s32.totalorder %s834_s19, 2  ;;  %s518_s16 = sand.u32 1, %s806_s12  }
 0x10a   : > { %s519_s20 = scalar_lea.sflag [#allocation3], %s518_s16 }
 0x10b   : > { %p671_p2 = pnand %p674_p1, %p920_p8 }
 0x10d   : > { %p672_p4 = pneg %p671_p2 }
 0x10f   : > { %801 = dma.done.wait (%p672_p4), %s519_s20, 2048  }
 0x110   : > { %803 = vsyncadd (%p672_p4), %s519_s20, 4294965248  ;;  %s16_s19 = sadd.s32 1, %s834_s19   ;;  %s1133_s12 = smov %s810_s13 }
 0x111   : > { %p13_p5 = scmp.ge.s32.totalorder %s16_s19, 10   ;;  %s1134_s13 = smov %s814_s14 }
 0x112   : > { %s1135_s14 = smov %s929_s30  ;;  %s1136_s15 = smov %s826_s17 }
 0x113   : > { %s1137_s16 = smov %s830_s18  ;;  %s1138_s17 = smov %s1141_s22 }
 0x114   : > { %s1139_s18 = smov %s1145_s23  ;;  %15 = sbr.rel (!%p13_p5) target bundleno = 5 (0x5), region = 73 }
 0x119   :  { %524 = vsyncpa [#allocation3], 1 }
 0x11a   :  { %526 = vsyncpa [#allocation3 + $0x1], 1 }

// kernel: length_regulator_forward.2
= control target key start
LH: loop header
LB: loop body
LE: loop exit
PB: predicated region body
PF: predicated region fallthrough
CT: control target
= control target key end

     0   :  { %s1469_s0 = inlined_call_operand.hbm [shape: f32[2,16,128], index: 0, kind: input, shape index: {}]   ;;  %s1470_s1 = inlined_call_operand.hbm [shape: f32[3,128,128], index: 1, kind: input, shape index: {}]   ;;  %s1471_s2 = inlined_call_operand.vmem [shape: f32[1,128], index: 2, kind: input, shape index: {}]   ;;  %s1472_s3 = inlined_call_operand.vmem [shape: f32[1,128], index: 3, kind: input, shape index: {}]   ;;  %s1473_s4 = inlined_call_operand.vmem [shape: f32[1,128], index: 4, kind: input, shape index: {}]   ;;  %s1474_s5 = inlined_call_operand.hbm [shape: f32[3,128,128], index: 5, kind: input, shape index: {}]   ;;  %s1475_s6 = inlined_call_operand.vmem [shape: f32[1,128], index: 6, kind: input, shape index: {}]   ;;  %s1476_s7 = inlined_call_operand.vmem [shape: f32[1,128], index: 7, kind: input, shape index: {}]   ;;  %s1477_s8 = inlined_call_operand.vmem [shape: f32[1,128], index: 8, kind: input, shape index: {}]   ;;  %s1478_s9 = inlined_call_operand.hbm [shape: f32[1,128], index: 9, kind: input, shape index: {}]   ;;  %s1479_s10 = inlined_call_operand.<no memory space> [shape: f32[1,1], index: 10, kind: input, shape index: {}]   ;;  %s1480_s11 = inlined_call_operand.vmem [shape: s32[2,1,16], index: 11, kind: output, shape index: {0}]   ;;  %s1481_s12 = inlined_call_operand.vmem [shape: s32[2,1,16], index: 12, kind: output, shape index: {1}]  }
   0x1   :  { %v18_v0 = vstv %s1479_s10 }
   0x2   :  { %19 = vst [vmem:[#allocation2] sm:$0x1] %v18_v0 }
   0x3   :  { %20 = vsyncpa [#allocation4], 0 }
   0x4   :  { %21 = vsyncpa [#allocation6], 0 }
   0x5   :  { %22 = vsyncpa [#allocation9], 0  ;;  %s1258_s23 = smov [#allocation5]   ;;  %s1259_s25 = smov [#allocation3]  }
   0x6   :  { %s40_s24 = sshll.u32 %s1258_s23, 4  ;;  %s28_s26 = sshll.u32 %s1259_s25, 4  ;;  %s41_s24 = int_to_ptr.vmem [resolvable:$true] %s40_s24  ;;  %s29_s26 = int_to_ptr.vmem [resolvable:$true] %s28_s26 }
   0x7   :  { %s1180_s27 = scalar_lea.vmem %s41_s24, 6144  ;;  %p1185_p1 = scmp.lt.s32.totalorder %s41_s24, %s41_s24 }
   0x8   :  { %p1181_p0 = scmp.ne.s32.totalorder %s41_s24, %s1180_s27  ;;  %p1186_p2 = scmp.lt.s32.totalorder %s1180_s27, %s1180_s27 }
   0xa   :  { %p1187_p3 = por %p1186_p2, %p1185_p1 }
   0xc   :  { %p1188_p4 = pnand %p1187_p3, %p1181_p0 }
   0xe   :  { %1191 = shalt.err (!%p1188_p4)
}
   0xf   :  { %s1260_s28 = smov 128   ;;  %s1261_s29 = smov 8  }
  0x10   :  { %46 = dma.hbm_to_vmem [thread:$0]  %s1470_s1, 6144, %s41_s24, [#allocation6], %s1260_s28, %s1260_s28, %s1261_s29  }
  0x11   :  { %s1200_s13 = scalar_lea.vmem %s29_s26, 512  ;;  %p1205_p6 = scmp.lt.s32.totalorder %s29_s26, %s29_s26 }
  0x12   :  { %p1201_p5 = scmp.ne.s32.totalorder %s29_s26, %s1200_s13  ;;  %p1206_p7 = scmp.lt.s32.totalorder %s1200_s13, %s1200_s13 }
  0x14   :  { %p1207_p8 = por %p1206_p7, %p1205_p6 }
  0x16   :  { %p1208_p9 = pnand %p1207_p8, %p1201_p5 }
  0x18   :  { %1211 = shalt.err (!%p1208_p9)
}
  0x19   :  { %34 = dma.hbm_to_vmem [thread:$0]  %s1469_s0, 512, %s29_s26, [#allocation4], %s1260_s28, %s1260_s28, %s1261_s29  }
  0x1a   :  { %s1262_s16 = smov [#allocation7]   ;;  %s1263_s18 = smov [#allocation8]  }
  0x1b   :  { %s58_s17 = sshll.u32 %s1262_s16, 4  ;;  %s77_s19 = sshll.u32 %s1263_s18, 4  ;;  %s59_s17 = int_to_ptr.vmem [resolvable:$true] %s58_s17  ;;  %s78_s19 = int_to_ptr.vmem [resolvable:$true] %s77_s19 }
  0x1c   :  { %s1220_s20 = scalar_lea.vmem %s59_s17, 6144  ;;  %p1225_p11 = scmp.lt.s32.totalorder %s59_s17, %s59_s17 }
  0x1d   :  { %p1221_p10 = scmp.ne.s32.totalorder %s59_s17, %s1220_s20  ;;  %p1226_p12 = scmp.lt.s32.totalorder %s1220_s20, %s1220_s20 }
  0x1f   :  { %p1227_p13 = por %p1226_p12, %p1225_p11 }
  0x21   :  { %p1228_p0 = pnand %p1227_p13, %p1221_p10 }
  0x23   :  { %1231 = shalt.err (!%p1228_p0)
}
  0x24   :  { %64 = dma.hbm_to_vmem [thread:$0]  %s1474_s5, 6144, %s59_s17, [#allocation6], %s1260_s28, %s1260_s28, %s1261_s29  }
  0x25   :  { %s1240_s22 = scalar_lea.vmem %s78_s19, 16  ;;  %s1244_s0 = scalar_lea.vmem %s78_s19, 32 }
  0x26   :  { %p1241_p1 = scmp.ne.s32.totalorder %s78_s19, %s1240_s22  ;;  %p1245_p2 = scmp.lt.s32.totalorder %s78_s19, %s78_s19 }
  0x27   :  { %p1246_p3 = scmp.lt.s32.totalorder %s1244_s0, %s1240_s22 }
  0x29   :  { %p1247_p4 = por %p1246_p3, %p1245_p2 }
  0x2b   :  { %p1248_p5 = pnand %p1247_p4, %p1241_p1 }
  0x2d   :  { %1251 = shalt.err (!%p1248_p5)
}
  0x2e   :  { %80 = dma.hbm_to_vmem [thread:$0]  %s1478_s9, 16, %s78_s19, [#allocation9]  }
  0x2f   :  { %1252 = dma.done.wait [#allocation4], 512  }
  0x30   :  { %1253 = vsyncadd [#allocation4], 4294966784 }
  0x31   :  { %1254 = dma.done.wait [#allocation6], 12288  }
  0x32   :  { %1255 = vsyncadd [#allocation6], 4294955008 }
  0x33   :  { %1256 = dma.done.wait [#allocation9], 16  }
  0x34   :  { %1257 = vsyncadd [#allocation9], 4294967280  ;;  %v185_v1 = vld [vmem:[#allocation5 + $0xf0] sm:$0xff]  ;;  %v186_v2 = vld [vmem:[#allocation5 + $0xf8] sm:$0xff]  ;;  %vm104_vm0 = vcmask 1040384   ;;  %vm125_vm1 = vcmask 1046528  }
  0x35   :  { %v201_v3 = vld [vmem:[#allocation5 + $0x170] sm:$0xff]  ;;  %v224_v4 = vpack.c.bf16 %v186_v2, %v185_v1  ;;  %v202_v5 = vld [vmem:[#allocation5 + $0x178] sm:$0xff]  ;;  %v183_v10 = vld [vmem:[#allocation5 + $0xe0] sm:$0xff]  ;;  %vm140_vm2 = vcmask 1045504   ;;  %vm1264_vm4 = vmmov 1   ;;  %vm1268_vm8 = vmmov 0  }
  0x36   :  { %v169_v6 = vld [vmem:[#allocation5 + $0x70] sm:$0xff]  ;;  %v170_v7 = vld [vmem:[#allocation5 + $0x78] sm:$0xff]  ;;  %v232_v8 = vpack.c.bf16 %v202_v5, %v201_v3  ;;  %v184_v11 = vld [vmem:[#allocation5 + $0xe8] sm:$0xff]  ;;  %vm799_vm9 = vcmask 130112   ;;  %vm810_vm10 = vcmask 1041409   ;;  %vm812_vm11 = vcmask 130048  }
  0x37   :  { %v216_v9 = vpack.c.bf16 %v170_v7, %v169_v6  ;;  %v199_v12 = vld [vmem:[#allocation5 + $0x160] sm:$0xff]  ;;  %999 = vmatprep.subr.bf16.mxu0 %v224_v4  ;;  %v223_v13 = vpack.c.bf16 %v184_v11, %v183_v10  ;;  %v200_v14 = vld [vmem:[#allocation5 + $0x168] sm:$0xff]  ;;  %v181_v19 = vld [vmem:[#allocation5 + $0xd0] sm:$0xff]  ;;  %vm928_vm12 = vcmask 122880  }
  0x38   :  { %v167_v15 = vld [vmem:[#allocation5 + $0x60] sm:$0xff]  ;;  %v168_v16 = vld [vmem:[#allocation5 + $0x68] sm:$0xff]  ;;  %1078 = vmatprep.subr.bf16.mxu1 %v232_v8  ;;  %v231_v17 = vpack.c.bf16 %v200_v14, %v199_v12  ;;  %v182_v20 = vld [vmem:[#allocation5 + $0xd8] sm:$0xff] }
  0x39   :  { %1000 = vmatpush3.bf16.msra.mxu0 %v216_v9  ;;  %v215_v18 = vpack.c.bf16 %v168_v16, %v167_v15  ;;  %v197_v21 = vld [vmem:[#allocation5 + $0x150] sm:$0xff]  ;;  %1079 = vmatpush3.bf16.msra.mxu1 %v232_v8  ;;  %v222_v22 = vpack.c.bf16 %v182_v20, %v181_v19  ;;  %v198_v23 = vld [vmem:[#allocation5 + $0x158] sm:$0xff]  ;;  %v179_v27 = vld [vmem:[#allocation5 + $0xc0] sm:$0xff] }
  0x3a   :  { %1001 = vmatprep.subr.bf16.mxu0 %v223_v13  ;;  %v165_v24 = vld [vmem:[#allocation5 + $0x50] sm:$0xff]  ;;  %v166_v25 = vld [vmem:[#allocation5 + $0x58] sm:$0xff]  ;;  %1080 = vmatprep.subr.bf16.mxu1 %v231_v17  ;;  %v230_v26 = vpack.c.bf16 %v198_v23, %v197_v21  ;;  %v180_v28 = vld [vmem:[#allocation5 + $0xc8] sm:$0xff] }
  0x3b   :  { %v195_v29 = vld [vmem:[#allocation5 + $0x140] sm:$0xff]  ;;  %v196_v30 = vld [vmem:[#allocation5 + $0x148] sm:$0xff]  ;;  %v214_v31 = vpack.c.bf16 %v166_v25, %v165_v24  ;;  %v221_v32 = vpack.c.bf16 %v180_v28, %v179_v27  ;;  %v177_v36 = vld [vmem:[#allocation5 + $0xb0] sm:$0xff] }
  0x3c   :  { %v163_v33 = vld [vmem:[#allocation5 + $0x40] sm:$0xff]  ;;  %v164_v34 = vld [vmem:[#allocation5 + $0x48] sm:$0xff]  ;;  %v229_v35 = vpack.c.bf16 %v196_v30, %v195_v29  ;;  %v178_v37 = vld [vmem:[#allocation5 + $0xb8] sm:$0xff] }
  0x3d   :  { %1002 = vmatpush3.bf16.msra.mxu0 %v215_v18  ;;  %1081 = vmatpush3.bf16.msra.mxu1 %v231_v17  ;;  %v193_v38 = vld [vmem:[#allocation5 + $0x130] sm:$0xff]  ;;  %v194_v39 = vld [vmem:[#allocation5 + $0x138] sm:$0xff]  ;;  %v213_v40 = vpack.c.bf16 %v164_v34, %v163_v33  ;;  %v220_v42 = vpack.c.bf16 %v178_v37, %v177_v36  ;;  %v175_v44 = vld [vmem:[#allocation5 + $0xa0] sm:$0xff] }
  0x3e   :  { %1003 = vmatprep.subr.bf16.mxu0 %v222_v22  ;;  %1082 = vmatprep.subr.bf16.mxu1 %v230_v26  ;;  %v161_v41 = vld [vmem:[#allocation5 + $0x30] sm:$0xff]  ;;  %v162_v43 = vld [vmem:[#allocation5 + $0x38] sm:$0xff]  ;;  %v176_v45 = vld [vmem:[#allocation5 + $0xa8] sm:$0xff]  ;;  %v228_v46 = vpack.c.bf16 %v194_v39, %v193_v38 }
  0x3f   :  { %v191_v47 = vld [vmem:[#allocation5 + $0x120] sm:$0xff]  ;;  %v192_v48 = vld [vmem:[#allocation5 + $0x128] sm:$0xff]  ;;  %v173_v51 = vld [vmem:[#allocation5 + $0x90] sm:$0xff]  ;;  %v212_v53 = vpack.c.bf16 %v162_v43, %v161_v41  ;;  %v219_v57 = vpack.c.bf16 %v176_v45, %v175_v44 }
  0x40   :  { %v159_v49 = vld [vmem:[#allocation5 + $0x20] sm:$0xff]  ;;  %v160_v50 = vld [vmem:[#allocation5 + $0x28] sm:$0xff]  ;;  %v174_v52 = vld [vmem:[#allocation5 + $0x98] sm:$0xff]  ;;  %v227_v62 = vpack.c.bf16 %v192_v48, %v191_v47 }
  0x41   :  { %1004 = vmatpush3.bf16.msra.mxu0 %v214_v31  ;;  %1083 = vmatpush3.bf16.msra.mxu1 %v230_v26  ;;  %v96_v54 = vld [vmem:[#allocation3] sm:$0xff]  ;;  %v97_v55 = vld [vmem:[#allocation3 + $0x8] sm:$0xff]  ;;  %v98_v56 = vld [vmem:[#allocation3 + $0x10] sm:$0xff]  ;;  %v211_v63 = vpack.c.bf16 %v160_v50, %v159_v49  ;;  %v218_v1 = vpack.c.bf16 %v174_v52, %v173_v51 }
  0x42   :  { %1005 = vmatprep.subr.bf16.mxu0 %v221_v32  ;;  %1084 = vmatprep.subr.bf16.mxu1 %v229_v35  ;;  %v1350_v58 = vrot.slane %v96_v54, 7  ;;  %v106_v59 = vrot.slane %v97_v55, 7  ;;  %v99_v60 = vld [vmem:[#allocation3 + $0x18] sm:$0xff]  ;;  %v1352_v61 = vrot.slane %v98_v56, 7  ;;  %v189_v2 = vld [vmem:[#allocation5 + $0x110] sm:$0xff]  ;;  %v171_v13 = vld [vmem:[#allocation5 + $0x80] sm:$0xff] }
  0x43   :  { %v109_v0 = vrot.slane %v99_v60, 7  ;;  %v190_v3 = vld [vmem:[#allocation5 + $0x118] sm:$0xff]  ;;  %v157_v7 = vld [vmem:[#allocation5 + $0x10] sm:$0xff]  ;;  %v172_v14 = vld [vmem:[#allocation5 + $0x88] sm:$0xff] }
  0x44   :  { %v1356_v4 = vsel %vm104_vm0, %v1350_v58, %v106_v59  ;;  %v117_v5 = vsel %vm104_vm0, 0.0, %v1350_v58  ;;  %v119_v6 = vsel %vm104_vm0, %v106_v59, 0.0  ;;  %v158_v8 = vld [vmem:[#allocation5 + $0x18] sm:$0xff]  ;;  %v118_v18 = vsel %vm104_vm0, 0.0, %v1352_v61  ;;  %v187_v24 = vld [vmem:[#allocation5 + $0x100] sm:$0xff]  ;;  %v188_v25 = vld [vmem:[#allocation5 + $0x108] sm:$0xff] }
  0x45   :  { %1006 = vmatpush3.bf16.msra.mxu0 %v213_v40  ;;  %1085 = vmatpush3.bf16.msra.mxu1 %v229_v35  ;;  %v126_v9 = vrot.slane %v117_v5, 1  ;;  %v127_v10 = vrot.slane %v1356_v4, 1  ;;  %v129_v11 = vrot.slane %v119_v6, 1  ;;  %v141_v12 = vrot.slane %v117_v5, 2  ;;  %v155_v33 = vld [vmem:[#allocation5] sm:$0xff]  ;;  %v156_v34 = vld [vmem:[#allocation5 + $0x8] sm:$0xff]  ;;  %vm967_vm3 = vmneg %vm104_vm0 }
  0x46   :  { %1007 = vmatprep.subr.bf16.mxu0 %v220_v42  ;;  %1086 = vmatprep.subr.bf16.mxu1 %v228_v46  ;;  %v142_v15 = vrot.slane %v1356_v4, 2  ;;  %v144_v16 = vrot.slane %v119_v6, 2  ;;  %v110_v17 = vsel %vm104_vm0, %v1352_v61, %v109_v0  ;;  %v226_v19 = vpack.c.bf16 %v190_v3, %v189_v2  ;;  %vm1379_vm5 = vmpackc.low %vm1264_vm4, %vm967_vm3 }
  0x47   :  { %v128_v20 = vsel %vm125_vm1, %v126_v9, %v127_v10  ;;  %v130_v21 = vsel %vm125_vm1, %v127_v10, %v129_v11  ;;  %v120_v22 = vsel %vm104_vm0, %v109_v0, 0.0  ;;  %v210_v23 = vpack.c.bf16 %v158_v8, %v157_v7 }
  0x48   :  { %v204_v26 = vpack.c.bf16 %v130_v21, %v128_v20  ;;  %v143_v27 = vsel %vm140_vm2, %v141_v12, %v142_v15  ;;  %v145_v28 = vsel %vm140_vm2, %v142_v15, %v144_v16  ;;  %v217_v29 = vpack.c.bf16 %v172_v14, %v171_v13 }
  0x49   :  { %1008 = vmatpush3.bf16.msra.mxu0 %v212_v53  ;;  %1087 = vmatpush3.bf16.msra.mxu1 %v228_v46  ;;  %v205_v30 = vpack.c.bf16 %v145_v28, %v143_v27  ;;  %v146_v31 = vrot.slane %v118_v18, 2  ;;  %v147_v32 = vrot.slane %v110_v17, 2  ;;  %v149_v35 = vrot.slane %v120_v22, 2  ;;  %v966_v53 = vld [vmem:[%s1471_s2] ss:$0 sm:$0xff] }
  0x4a   :  { %1009 = vmatprep.subr.bf16.mxu0 %v219_v57  ;;  %1088 = vmatprep.subr.bf16.mxu1 %v227_v62  ;;  %v131_v36 = vrot.slane %v118_v18, 1  ;;  %v132_v37 = vrot.slane %v110_v17, 1  ;;  %v134_v38 = vrot.slane %v120_v22, 1  ;;  %v225_v39 = vpack.c.bf16 %v188_v25, %v187_v24 }
  0x4b   :  { %272 = vmatprep.mubr.bf16.mxu0 %v204_v26  ;;  %1094 = vmatprep.mubr.bf16.mxu1 %v205_v30  ;;  %v209_v40 = vpack.c.bf16 %v156_v34, %v155_v33  ;;  %v148_v41 = vsel %vm140_vm2, %v146_v31, %v147_v32  ;;  %v150_v42 = vsel %vm140_vm2, %v147_v32, %v149_v35  ;;  %v491_v31 = vld [vmem:[#allocation7 + $0xf0] sm:$0xff]  ;;  %v492_v32 = vld [vmem:[#allocation7 + $0xf8] sm:$0xff] }
  0x4c   :  { %v133_v43 = vsel %vm125_vm1, %v131_v36, %v132_v37  ;;  %v135_v44 = vsel %vm125_vm1, %v132_v37, %v134_v38  ;;  %v969_v45 = vpack.c.bf16 %v1356_v4, %v1350_v58  ;;  %v208_v47 = vpack.c.bf16 %v150_v42, %v148_v41  ;;  %v475_v34 = vld [vmem:[#allocation7 + $0x70] sm:$0xff]  ;;  %v476_v35 = vld [vmem:[#allocation7 + $0x78] sm:$0xff]  ;;  %v489_v37 = vld [vmem:[#allocation7 + $0xe0] sm:$0xff] }
  0x4d   :  { %1010 = vmatpush3.bf16.msra.mxu0 %v211_v63  ;;  %1089 = vmatpush3.bf16.msra.mxu1 %v227_v62  ;;  %v207_v48 = vpack.c.bf16 %v135_v44, %v133_v43  ;;  %v973_v49 = vpack.c.bf16 %v110_v17, %v1352_v61  ;;  %v530_v33 = vpack.c.bf16 %v492_v32, %v491_v31  ;;  %v490_v38 = vld [vmem:[#allocation7 + $0xe8] sm:$0xff]  ;;  %v507_v43 = vld [vmem:[#allocation7 + $0x170] sm:$0xff]  ;;  %v508_v44 = vld [vmem:[#allocation7 + $0x178] sm:$0xff] }
  0x4e   :  { %1011 = vmatprep.subr.bf16.mxu0 %v218_v1  ;;  %1090 = vmatprep.subr.bf16.mxu1 %v226_v19  ;;  %v522_v36 = vpack.c.bf16 %v476_v35, %v475_v34  ;;  %v474_v41 = vld [vmem:[#allocation7 + $0x68] sm:$0xff]  ;;  %v477_v31 = vld [vmem:[#allocation7 + $0x80] sm:$0xff] }
  0x4f   :  { %v461_v34 = vld [vmem:[#allocation7] sm:$0xff]  ;;  %v462_v35 = vld [vmem:[#allocation7 + $0x8] sm:$0xff] }
  0x51   :  { %1012 = vmatpush3.bf16.msra.mxu0 %v210_v23  ;;  %1091 = vmatpush3.bf16.msra.mxu1 %v226_v19 }
  0x52   :  { %1013 = vmatprep.subr.bf16.mxu0 %v217_v29  ;;  %1092 = vmatprep.subr.bf16.mxu1 %v225_v39 }
  0x55   :  { %1014 = vmatpush3.bf16.msra.mxu0 %v209_v40  ;;  %1093 = vmatpush3.bf16.msra.mxu1 %v225_v39  ;;  %v529_v39 = vpack.c.bf16 %v490_v38, %v489_v37  ;;  %v473_v40 = vld [vmem:[#allocation7 + $0x60] sm:$0xff]  ;;  %v515_v37 = vpack.c.bf16 %v462_v35, %v461_v34  ;;  %v495_v38 = vld [vmem:[#allocation7 + $0x110] sm:$0xff] }
  0x56   :  { %1037 = vmatprep.subr.bf16.mxu0 %v530_v33  ;;  %v521_v42 = vpack.c.bf16 %v474_v41, %v473_v40  ;;  %v478_v33 = vld [vmem:[#allocation7 + $0x88] sm:$0xff]  ;;  %v493_v41 = vld [vmem:[#allocation7 + $0x100] sm:$0xff] }
  0x58   :  { %970 = vmatmul.mubr.msk.bf16.vlgmr.msra.gmra.mxu0 %vm1379_vm5, %v969_v45  ;;  %1095 = vmatmul.mubr.bf16.vlgmr.msra.gmra.mxu1 %v208_v47  ;;  %v538_v45 = vpack.c.bf16 %v508_v44, %v507_v43  ;;  %v487_v47 = vld [vmem:[#allocation7 + $0xd0] sm:$0xff] }
  0x59   :  { %280 = vmatprep.mubr.bf16.mxu0 %v207_v48  ;;  %1038 = vmatpush3.bf16.msra.mxu0 %v522_v36  ;;  %v488_v48 = vld [vmem:[#allocation7 + $0xd8] sm:$0xff]  ;;  %v523_v36 = vpack.c.bf16 %v478_v33, %v477_v31 }
  0x5a   :  { %1039 = vmatprep.subr.bf16.mxu0 %v529_v39  ;;  %1098 = vmatprep.subr.bf16.mxu1 %v538_v45  ;;  %v496_v39 = vld [vmem:[#allocation7 + $0x118] sm:$0xff] }
  0x5b   :  { %1099 = vmatpush3.bf16.msra.mxu1 %v538_v45  ;;  %v532_v40 = vpack.c.bf16 %v496_v39, %v495_v38 }
  0x5d   :  { %1040 = vmatpush3.bf16.msra.mxu0 %v521_v42  ;;  %v494_v42 = vld [vmem:[#allocation7 + $0x108] sm:$0xff] }
  0x5e   :  { %v531_v43 = vpack.c.bf16 %v494_v42, %v493_v41 }
  0x60   :  { %974 = vmatmul.mubr.msk.bf16.gmra.mxu0 %vm1379_vm5, %v973_v49  ;;  %v528_v49 = vpack.c.bf16 %v488_v48, %v487_v47 }
  0x62   :  { %1041 = vmatprep.subr.bf16.mxu0 %v528_v49 }
 0x118   :  { %v1015_v50 = vpop.f32.mrf.mxu0  ;;  %v1096_v51 = vpop.f32.mrf.mxu1 }
 0x11a   :  { %v1016_v52 = vpop.f32.mrf.mxu0  ;;  %v323_v55 = vpop.f32.mrf.mxu1 }
 0x11b   :  { %v1017_v54 = vadd.f32 %v1016_v52, %v1015_v50  ;;  %v471_v50 = vld [vmem:[#allocation7 + $0x50] sm:$0xff] }
 0x11c   :  { %v1018_v56 = vpop.f32.mrf.mxu0  ;;  %v1097_v58 = vpop.f32.mrf.mxu1 }
 0x11d   :  { %v275_v57 = vadd.f32 %v1017_v54, %v966_v53  ;;  %v506_v54 = vld [vmem:[#allocation7 + $0x168] sm:$0xff] }
 0x11e   :  { %v1019_v59 = vpop.f32.mrf.mxu0  ;;  %v326_v1 = vpop.f32.mrf.mxu1 }
 0x11f   :  { %v324_v60 = vadd.f32 %v323_v55, %v275_v57  ;;  %v1020_v62 = vadd.f32 %v1019_v59, %v1018_v56  ;;  %v485_v56 = vld [vmem:[#allocation7 + $0xc0] sm:$0xff]  ;;  %v486_v57 = vld [vmem:[#allocation7 + $0xc8] sm:$0xff] }
 0x120   :  { %v1021_v63 = vpop.f32.mrf.mxu0  ;;  %v469_v59 = vld [vmem:[#allocation7 + $0x40] sm:$0xff] }
 0x121   :  { %v338_v61 = vmax.f32 %v324_v60, 0.0  ;;  %v278_v0 = vadd.f32 %v1020_v62, %v966_v53  ;;  %v470_v60 = vld [vmem:[#allocation7 + $0x48] sm:$0xff] }
 0x122   :  { %v1022_v2 = vpop.f32.mrf.mxu0  ;;  %v519_v62 = vpack.c.bf16 %v470_v60, %v469_v59  ;;  %v976_v60 = vld [vmem:[%s1473_s4] ss:$0 sm:$0xff] }
 0x123   :  { %v327_v3 = vadd.f32 %v326_v1, %v278_v0  ;;  %v1023_v4 = vadd.f32 %v1022_v2, %v1021_v63  ;;  %342 = vadd.xlane.f32.xlu0 %v338_v61  ;;  %v503_v63 = vld [vmem:[#allocation7 + $0x150] sm:$0xff]  ;;  %v484_v2 = vld [vmem:[#allocation7 + $0xb8] sm:$0xff] }
 0x124   :  { %v1024_v5 = vpop.f32.mrf.mxu0  ;;  %v483_v1 = vld [vmem:[#allocation7 + $0xb0] sm:$0xff] }
 0x125   :  { %v339_v6 = vmax.f32 %v327_v3, 0.0  ;;  %v283_v7 = vadd.f32 %v1023_v4, %v966_v53  ;;  %v526_v3 = vpack.c.bf16 %v484_v2, %v483_v1  ;;  %v467_v4 = vld [vmem:[#allocation7 + $0x30] sm:$0xff] }
 0x126   :  { %v1025_v8 = vpop.f32.mrf.mxu0 }
 0x127   :  { %v1026_v9 = vadd.f32 %v1025_v8, %v1024_v5  ;;  %344 = vadd.xlane.f32.xlu0 %v339_v6  ;;  %v332_v10 = vadd.f32 %v1096_v51, %v283_v7  ;;  %v472_v51 = vld [vmem:[#allocation7 + $0x58] sm:$0xff]  ;;  %v501_v7 = vld [vmem:[#allocation7 + $0x140] sm:$0xff]  ;;  %v502_v8 = vld [vmem:[#allocation7 + $0x148] sm:$0xff] }
 0x128   :  { %v520_v52 = vpack.c.bf16 %v472_v51, %v471_v50  ;;  %v468_v5 = vld [vmem:[#allocation7 + $0x38] sm:$0xff] }
 0x129   :  { %v286_v11 = vadd.f32 %v1026_v9, %v966_v53  ;;  %v340_v12 = vmax.f32 %v332_v10, 0.0  ;;  %v505_v53 = vld [vmem:[#allocation7 + $0x160] sm:$0xff]  ;;  %v535_v9 = vpack.c.bf16 %v502_v8, %v501_v7 }
 0x12a   :  { %1042 = vmatpush3.bf16.msra.mxu0 %v520_v52  ;;  %v537_v55 = vpack.c.bf16 %v506_v54, %v505_v53  ;;  %v481_v10 = vld [vmem:[#allocation7 + $0xa0] sm:$0xff] }
 0x12b   :  { %346 = vadd.xlane.f32.xlu1 %v340_v12  ;;  %v335_v13 = vadd.f32 %v1097_v58, %v286_v11  ;;  %v527_v58 = vpack.c.bf16 %v486_v57, %v485_v56  ;;  %v482_v11 = vld [vmem:[#allocation7 + $0xa8] sm:$0xff] }
 0x12c   :  { %1100 = vmatprep.subr.bf16.mxu1 %v537_v55 }
 0x12d   :  { %v341_v14 = vmax.f32 %v335_v13, 0.0  ;;  %1043 = vmatprep.subr.bf16.mxu0 %v527_v58  ;;  %1101 = vmatpush3.bf16.msra.mxu1 %v537_v55  ;;  %v465_v13 = vld [vmem:[#allocation7 + $0x20] sm:$0xff]  ;;  %v975_v58 = vld [vmem:[%s1472_s3] ss:$0 sm:$0xff] }
 0x12e   :  { %1044 = vmatpush3.bf16.msra.mxu0 %v519_v62 }
 0x12f   :  { %348 = vadd.xlane.f32.xlu1 %v341_v14  ;;  %1045 = vmatprep.subr.bf16.mxu0 %v526_v3 }
 0x1ac   :  { %v343_v15 = vpop.xlane.xlu0 %342 }
 0x1ad   :  { %v351_v16 = vmul.f32 0.0078125, %v343_v15 }
 0x1af   :  { %v1391_v17 = vsub.f32 %v338_v61, %v351_v16  ;;  %v504_v61 = vld [vmem:[#allocation7 + $0x158] sm:$0xff]  ;;  %v499_v16 = vld [vmem:[#allocation7 + $0x130] sm:$0xff] }
 0x1b0   :  { %v345_v18 = vpop.xlane.xlu0 %344  ;;  %v536_v0 = vpack.c.bf16 %v504_v61, %v503_v63 }
 0x1b1   :  { %v352_v19 = vmul.f32 0.0078125, %v345_v18  ;;  %v359_v20 = vmul.f32 %v1391_v17, %v1391_v17  ;;  %v500_v18 = vld [vmem:[#allocation7 + $0x138] sm:$0xff] }
 0x1b2   :  { %1102 = vmatprep.subr.bf16.mxu1 %v536_v0 }
 0x1b3   :  { %v1395_v21 = vsub.f32 %v339_v6, %v352_v19  ;;  %363 = vadd.xlane.f32.xlu0 %v359_v20  ;;  %v518_v6 = vpack.c.bf16 %v468_v5, %v467_v4  ;;  %1103 = vmatpush3.bf16.msra.mxu1 %v536_v0  ;;  %v534_v19 = vpack.c.bf16 %v500_v18, %v499_v16  ;;  %v479_v20 = vld [vmem:[#allocation7 + $0x90] sm:$0xff] }
 0x1b4   :  { %v347_v22 = vpop.xlane.xlu1 %346  ;;  %1104 = vmatprep.subr.bf16.mxu1 %v535_v9 }
 0x1b5   :  { %v353_v23 = vmul.f32 0.0078125, %v347_v22  ;;  %v360_v24 = vmul.f32 %v1395_v21, %v1395_v21  ;;  %1046 = vmatpush3.bf16.msra.mxu0 %v518_v6  ;;  %v480_v22 = vld [vmem:[#allocation7 + $0x98] sm:$0xff] }
 0x1b7   :  { %v1399_v25 = vsub.f32 %v340_v12, %v353_v23  ;;  %365 = vadd.xlane.f32.xlu1 %v360_v24  ;;  %v525_v12 = vpack.c.bf16 %v482_v11, %v481_v10  ;;  %1105 = vmatpush3.bf16.msra.mxu1 %v535_v9  ;;  %v524_v23 = vpack.c.bf16 %v480_v22, %v479_v20  ;;  %v463_v24 = vld [vmem:[#allocation7 + $0x10] sm:$0xff] }
 0x1b8   :  { %v349_v26 = vpop.xlane.xlu1 %348  ;;  %1106 = vmatprep.subr.bf16.mxu1 %v534_v19 }
 0x1b9   :  { %v354_v27 = vmul.f32 0.0078125, %v349_v26  ;;  %v361_v28 = vmul.f32 %v1399_v25, %v1399_v25  ;;  %1047 = vmatprep.subr.bf16.mxu0 %v525_v12  ;;  %v464_v26 = vld [vmem:[#allocation7 + $0x18] sm:$0xff] }
 0x1bb   :  { %v1403_v29 = vsub.f32 %v341_v14, %v354_v27  ;;  %367 = vadd.xlane.f32.xlu0 %v361_v28  ;;  %v466_v14 = vld [vmem:[#allocation7 + $0x28] sm:$0xff]  ;;  %v516_v27 = vpack.c.bf16 %v464_v26, %v463_v24  ;;  %1107 = vmatpush3.bf16.msra.mxu1 %v534_v19  ;;  %v497_v28 = vld [vmem:[#allocation7 + $0x120] sm:$0xff] }
 0x1bc   :  { %v517_v15 = vpack.c.bf16 %v466_v14, %v465_v13 }
 0x1bd   :  { %v362_v30 = vmul.f32 %v1403_v29, %v1403_v29 }
 0x1be   :  { %1048 = vmatpush3.bf16.msra.mxu0 %v517_v15 }
 0x1bf   :  { %369 = vadd.xlane.f32.xlu1 %v362_v30  ;;  %1049 = vmatprep.subr.bf16.mxu0 %v524_v23  ;;  %v498_v30 = vld [vmem:[#allocation7 + $0x128] sm:$0xff] }
 0x1c0   :  { %v533_v32 = vpack.c.bf16 %v498_v30, %v497_v28 }
 0x1c2   :  { %1050 = vmatpush3.bf16.msra.mxu0 %v516_v27  ;;  %1108 = vmatprep.subr.bf16.mxu1 %v533_v32 }
 0x1c3   :  { %1051 = vmatprep.subr.bf16.mxu0 %v523_v36  ;;  %1109 = vmatpush3.bf16.msra.mxu1 %v533_v32 }
 0x1c4   :  { %1110 = vmatprep.subr.bf16.mxu1 %v532_v40 }
 0x1c6   :  { %1052 = vmatpush3.bf16.msra.mxu0 %v515_v37 }
 0x1c7   :  { %1111 = vmatpush3.bf16.msra.mxu1 %v532_v40 }
 0x1c8   :  { %1112 = vmatprep.subr.bf16.mxu1 %v531_v43 }
 0x1cb   :  { %1113 = vmatpush3.bf16.msra.mxu1 %v531_v43 }
 0x23c   :  { %v364_v44 = vpop.xlane.xlu0 %363 }
 0x23d   :  { %v371_v45 = vmul.f32 0.0078125, %v364_v44 }
 0x23f   :  { %v375_v47 = vadd.f32 1e-05, %v371_v45 }
 0x240   :  { %v366_v48 = vpop.xlane.xlu1 %365 }
 0x241   :  { %1148 = vrsqrt.f32 %v375_v47  ;;  %v372_v49 = vmul.f32 0.0078125, %v366_v48 }
 0x243   :  { %v376_v50 = vadd.f32 1e-05, %v372_v49 }
 0x244   :  { %v368_v51 = vpop.xlane.xlu0 %367 }
 0x245   :  { %1150 = vrsqrt.f32 %v376_v50  ;;  %v373_v52 = vmul.f32 0.0078125, %v368_v51 }
 0x247   :  { %v377_v53 = vadd.f32 1e-05, %v373_v52  ;;  %v977_v52 = vld [vmem:[%s1475_s6] ss:$0 sm:$0xff] }
 0x248   :  { %v370_v54 = vpop.xlane.xlu1 %369 }
 0x249   :  { %1152 = vrsqrt.f32 %v377_v53  ;;  %v374_v55 = vmul.f32 0.0078125, %v370_v54 }
 0x24b   :  { %v378_v56 = vadd.f32 1e-05, %v374_v55 }
 0x24d   :  { %1154 = vrsqrt.f32 %v378_v56 }
 0x24e   :  { %v1149_v57 = vpop.eup %1148 }
 0x24f   :  { %v383_v59 = vmul.f32 %v1149_v57, %v1391_v17 }
 0x251   :  { %v394_v62 = vmul.f32 %v975_v58, %v383_v59 }
 0x252   :  { %v1151_v63 = vpop.eup %1150 }
 0x253   :  { %v384_v61 = vmul.f32 %v1151_v63, %v1395_v21  ;;  %v405_v0 = vadd.f32 %v976_v60, %v394_v62 }
 0x255   :  { %v395_v1 = vmul.f32 %v975_v58, %v384_v61  ;;  %v413_v2 = vrot.slane %v405_v0, 7 }
 0x256   :  { %v1153_v3 = vpop.eup %1152 }
 0x257   :  { %v385_v4 = vmul.f32 %v1153_v3, %v1399_v25  ;;  %v406_v5 = vadd.f32 %v976_v60, %v395_v1  ;;  %v425_v6 = vsel %vm104_vm0, 0.0, %v413_v2 }
 0x258   :  { %v433_v9 = vrot.slane %v425_v6, 1  ;;  %v447_v15 = vrot.slane %v425_v6, 2 }
 0x259   :  { %v414_v7 = vrot.slane %v406_v5, 7  ;;  %v396_v8 = vmul.f32 %v975_v58, %v385_v4 }
 0x25a   :  { %v1155_v17 = vpop.eup %1154 }
 0x25b   :  { %v386_v10 = vmul.f32 %v1155_v17, %v1403_v29  ;;  %v415_v11 = vsel %vm104_vm0, %v413_v2, %v414_v7  ;;  %v427_v12 = vsel %vm104_vm0, %v414_v7, 0.0  ;;  %v407_v21 = vadd.f32 %v976_v60, %v396_v8 }
 0x25c   :  { %v434_v13 = vrot.slane %v415_v11, 1  ;;  %v436_v14 = vrot.slane %v427_v12, 1  ;;  %v448_v16 = vrot.slane %v415_v11, 2  ;;  %v450_v18 = vrot.slane %v427_v12, 2 }
 0x25d   :  { %v397_v25 = vmul.f32 %v975_v58, %v386_v10  ;;  %v416_v19 = vrot.slane %v407_v21, 7  ;;  %v980_v27 = vpack.c.bf16 %v415_v11, %v413_v2 }
 0x25e   :  { %v435_v20 = vsel %vm125_vm1, %v433_v9, %v434_v13  ;;  %v437_v22 = vsel %vm125_vm1, %v434_v13, %v436_v14  ;;  %v449_v23 = vsel %vm140_vm2, %v447_v15, %v448_v16  ;;  %v451_v29 = vsel %vm140_vm2, %v448_v16, %v450_v18 }
 0x25f   :  { %v510_v24 = vpack.c.bf16 %v437_v22, %v435_v20  ;;  %v408_v26 = vadd.f32 %v976_v60, %v397_v25  ;;  %v511_v28 = vpack.c.bf16 %v451_v29, %v449_v23  ;;  %v426_v30 = vsel %vm104_vm0, 0.0, %v416_v19 }
 0x260   :  { %v438_v34 = vrot.slane %v426_v30, 1  ;;  %v452_v35 = vrot.slane %v426_v30, 2 }
 0x261   :  { %578 = vmatprep.mubr.bf16.mxu0 %v510_v24  ;;  %v417_v31 = vrot.slane %v408_v26, 7  ;;  %1114 = vmatprep.mubr.bf16.mxu1 %v511_v28 }
 0x262   :  { %981 = vmatmul.mubr.msk.bf16.vlgmr.msra.gmra.mxu0 %vm1379_vm5, %v980_v27  ;;  %v1265_v27 = vmov 0  }
 0x263   :  { %v418_v32 = vsel %vm104_vm0, %v416_v19, %v417_v31  ;;  %v428_v33 = vsel %vm104_vm0, %v417_v31, 0.0  ;;  %1147 = vset.pattern.permute.xlu0 %v1265_v27 }
 0x264   :  { %v439_v36 = vrot.slane %v418_v32, 1  ;;  %v441_v37 = vrot.slane %v428_v33, 1  ;;  %v455_v38 = vrot.slane %v428_v33, 2  ;;  %v453_v39 = vrot.slane %v418_v32, 2 }
 0x265   :  { %v984_v47 = vpack.c.bf16 %v418_v32, %v416_v19 }
 0x266   :  { %v440_v40 = vsel %vm125_vm1, %v438_v34, %v439_v36  ;;  %v442_v41 = vsel %vm125_vm1, %v439_v36, %v441_v37  ;;  %v454_v42 = vsel %vm140_vm2, %v452_v35, %v453_v39  ;;  %v456_v43 = vsel %vm140_vm2, %v453_v39, %v455_v38 }
 0x267   :  { %v513_v44 = vpack.c.bf16 %v442_v41, %v440_v40  ;;  %v514_v45 = vpack.c.bf16 %v456_v43, %v454_v42  ;;  %v986_v42 = vld [vmem:[%s1476_s7] ss:$0 sm:$0xff] }
 0x269   :  { %586 = vmatprep.mubr.bf16.mxu0 %v513_v44  ;;  %1115 = vmatmul.mubr.bf16.vlgmr.msra.gmra.mxu1 %v514_v45  ;;  %v987_v44 = vld [vmem:[%s1477_s8] ss:$0 sm:$0xff] }
 0x26a   :  { %985 = vmatmul.mubr.msk.bf16.gmra.mxu0 %vm1379_vm5, %v984_v47 }
 0x322   :  { %v1053_v48 = vpop.f32.mrf.mxu0 }
 0x324   :  { %v1054_v49 = vpop.f32.mrf.mxu0 }
 0x325   :  { %v1055_v50 = vadd.f32 %v1054_v49, %v1053_v48  ;;  %v988_v48 = vld [vmem:[#allocation8] ss:$0 sm:$0xff] }
 0x326   :  { %v1056_v51 = vpop.f32.mrf.mxu0 }
 0x327   :  { %v581_v57 = vadd.f32 %v1055_v50, %v977_v52 }
 0x328   :  { %v1057_v53 = vpop.f32.mrf.mxu0 }
 0x329   :  { %v1116_v54 = vpop.f32.mrf.mxu1  ;;  %v1058_v55 = vadd.f32 %v1057_v53, %v1056_v51 }
 0x32a   :  { %v1059_v56 = vpop.f32.mrf.mxu0 }
 0x32b   :  { %v629_v58 = vpop.f32.mrf.mxu1  ;;  %v584_v0 = vadd.f32 %v1058_v55, %v977_v52 }
 0x32c   :  { %v630_v59 = vadd.f32 %v629_v58, %v581_v57  ;;  %v1060_v60 = vpop.f32.mrf.mxu0 }
 0x32d   :  { %v1061_v62 = vadd.f32 %v1060_v60, %v1059_v56  ;;  %v1117_v63 = vpop.f32.mrf.mxu1 }
 0x32e   :  { %v644_v46 = vmax.f32 %v630_v59, 0.0  ;;  %v1062_v61 = vpop.f32.mrf.mxu0 }
 0x32f   :  { %v589_v1 = vadd.f32 %v1061_v62, %v977_v52  ;;  %v632_v2 = vpop.f32.mrf.mxu1 }
 0x330   :  { %v633_v3 = vadd.f32 %v632_v2, %v584_v0  ;;  %648 = vadd.xlane.f32.xlu0 %v644_v46  ;;  %v1063_v4 = vpop.f32.mrf.mxu0  ;;  %v989_v0 = vld [vmem:[#allocation2] ss:$0 sm:$0xff] }
 0x331   :  { %v1064_v5 = vadd.f32 %v1063_v4, %v1062_v61  ;;  %v638_v6 = vadd.f32 %v1116_v54, %v589_v1  ;;  %v775_v1 = vlaneseq }
 0x332   :  { %v645_v7 = vmax.f32 %v633_v3, 0.0 }
 0x333   :  { %v592_v8 = vadd.f32 %v1064_v5, %v977_v52  ;;  %v646_v17 = vmax.f32 %v638_v6, 0.0  ;;  %v1444_v2 = vshrl.u32 %v775_v1, 7  ;;  %v779_v3 = vand.u32 127, %v775_v1 }
 0x334   :  { %650 = vadd.xlane.f32.xlu1 %v645_v7  ;;  %v1266_v5 = vmov 0.0   ;;  %v1267_v6 = vmov 1.0   ;;  %v1269_v1 = vmov 1966171168  }
 0x335   :  { %652 = vadd.xlane.f32.xlu0 %v646_v17  ;;  %v641_v9 = vadd.f32 %v1117_v63, %v592_v8  ;;  %v777_v4 = vadd.s32 8, %v1444_v2  ;;  %1118 = vmatprep.subr.mxu1 %v1266_v5  ;;  %vm780_vm7 = vcmp.le.s32.totalorder %v1444_v2, %v779_v3 }
 0x336   :  { %1122 = vmatprep.mubr.msk.f32.mxu1 %vm1268_vm8, %v1266_v5 }
 0x337   :  { %v647_v10 = vmax.f32 %v641_v9, 0.0  ;;  %vm781_vm6 = vcmp.le.s32.totalorder %v777_v4, %v779_v3 }
 0x338   :  { %1119 = vmatpush3.msk.msra.mxu1 %vm781_vm6, %v1267_v6 }
 0x339   :  { %654 = vadd.xlane.f32.xlu1 %v647_v10  ;;  %1120 = vmatprep.subr.mxu1 %v1266_v5 }
 0x33a   :  { %1121 = vmatpush3.msk.msra.mxu1 %vm780_vm7, %v1267_v6 }
 0x3b9   :  { %v649_v11 = vpop.xlane.xlu0 %648 }
 0x3ba   :  { %v656_v12 = vmul.f32 0.0078125, %v649_v11 }
 0x3bc   :  { %v660_v21 = vsub.f32 %v644_v46, %v656_v12 }
 0x3bd   :  { %v651_v13 = vpop.xlane.xlu1 %650 }
 0x3be   :  { %v657_v14 = vmul.f32 0.0078125, %v651_v13  ;;  %v653_v15 = vpop.xlane.xlu0 %652  ;;  %v664_v16 = vmul.f32 %v660_v21, %v660_v21 }
 0x3bf   :  { %v658_v18 = vmul.f32 0.0078125, %v653_v15 }
 0x3c0   :  { %v661_v25 = vsub.f32 %v645_v7, %v657_v14  ;;  %668 = vadd.xlane.f32.xlu0 %v664_v16 }
 0x3c1   :  { %v662_v19 = vsub.f32 %v646_v17, %v658_v18 }
 0x3c2   :  { %v655_v20 = vpop.xlane.xlu1 %654  ;;  %v665_v22 = vmul.f32 %v661_v25, %v661_v25 }
 0x3c3   :  { %v659_v23 = vmul.f32 0.0078125, %v655_v20  ;;  %v666_v24 = vmul.f32 %v662_v19, %v662_v19 }
 0x3c4   :  { %670 = vadd.xlane.f32.xlu1 %v665_v22 }
 0x3c5   :  { %v663_v29 = vsub.f32 %v647_v10, %v659_v23  ;;  %672 = vadd.xlane.f32.xlu0 %v666_v24  ;;  %v794_v23 = vadd.s32 4294967288, %v779_v3 }
 0x3c7   :  { %v667_v26 = vmul.f32 %v663_v29, %v663_v29 }
 0x3c9   :  { %674 = vadd.xlane.f32.xlu1 %v667_v26 }
 0x449   :  { %v669_v28 = vpop.xlane.xlu0 %668 }
 0x44a   :  { %v676_v30 = vmul.f32 0.0078125, %v669_v28 }
 0x44c   :  { %v680_v31 = vadd.f32 1e-05, %v676_v30 }
 0x44d   :  { %v671_v32 = vpop.xlane.xlu1 %670 }
 0x44e   :  { %1156 = vrsqrt.f32 %v680_v31  ;;  %v677_v33 = vmul.f32 0.0078125, %v671_v32  ;;  %v673_v34 = vpop.xlane.xlu0 %672  ;;  %v792_v31 = vsub.s32 %v779_v3, %v1444_v2  ;;  %v907_v3 = vunpack.c.l.s4 %v1269_v1 }
 0x44f   :  { %v678_v35 = vmul.f32 0.0078125, %v673_v34  ;;  %v797_v34 = vsub.s32 %v794_v23, %v1444_v2 }
 0x450   :  { %v681_v36 = vadd.f32 1e-05, %v677_v33  ;;  %v908_v4 = vunpack.c.0.s8 %v907_v3 }
 0x451   :  { %v682_v37 = vadd.f32 1e-05, %v678_v35 }
 0x452   :  { %1158 = vrsqrt.f32 %v681_v36  ;;  %v675_v38 = vpop.xlane.xlu1 %674 }
 0x453   :  { %1160 = vrsqrt.f32 %v682_v37  ;;  %v679_v39 = vmul.f32 0.0078125, %v675_v38 }
 0x455   :  { %v683_v40 = vadd.f32 1e-05, %v679_v39 }
 0x457   :  { %1162 = vrsqrt.f32 %v683_v40 }
 0x45b   :  { %v1157_v41 = vpop.eup %1156 }
 0x45c   :  { %v688_v43 = vmul.f32 %v1157_v41, %v660_v21 }
 0x45e   :  { %v699_v45 = vmul.f32 %v986_v42, %v688_v43 }
 0x45f   :  { %v1159_v47 = vpop.eup %1158 }
 0x460   :  { %v1161_v49 = vpop.eup %1160  ;;  %v710_v50 = vadd.f32 %v987_v44, %v699_v45  ;;  %v689_v51 = vmul.f32 %v1159_v47, %v661_v25 }
 0x461   :  { %v690_v52 = vmul.f32 %v1161_v49, %v662_v19 }
 0x462   :  { %v721_v53 = vmul.f32 %v988_v48, %v710_v50  ;;  %v700_v54 = vmul.f32 %v986_v42, %v689_v51 }
 0x463   :  { %v701_v55 = vmul.f32 %v986_v42, %v690_v52 }
 0x464   :  { %v1163_v56 = vpop.eup %1162  ;;  %725 = vadd.xlane.f32.xlu0 %v721_v53  ;;  %v711_v57 = vadd.f32 %v987_v44, %v700_v54 }
 0x465   :  { %v712_v58 = vadd.f32 %v987_v44, %v701_v55  ;;  %v691_v59 = vmul.f32 %v1163_v56, %v663_v29 }
 0x466   :  { %v722_v60 = vmul.f32 %v988_v48, %v711_v57 }
 0x467   :  { %v723_v62 = vmul.f32 %v988_v48, %v712_v58  ;;  %v702_v63 = vmul.f32 %v986_v42, %v691_v59 }
 0x468   :  { %727 = vadd.xlane.f32.xlu1 %v722_v60 }
 0x469   :  { %729 = vadd.xlane.f32.xlu0 %v723_v62  ;;  %v713_v46 = vadd.f32 %v987_v44, %v702_v63 }
 0x46b   :  { %v724_v61 = vmul.f32 %v988_v48, %v713_v46 }
 0x46d   :  { %731 = vadd.xlane.f32.xlu1 %v724_v61 }
 0x47f   :  { %740 = vperm.xlu0 %1147, %v989_v0  }
 0x4ed   :  { %v726_v7 = vpop.xlane.xlu0 %725 }
 0x4f1   :  { %v728_v8 = vpop.xlane.xlu1 %727 }
 0x4f2   :  { %v730_v17 = vpop.xlane.xlu0 %729 }
 0x4f6   :  { %v732_v9 = vpop.xlane.xlu1 %731 }
 0x4fa   :  { %v741_v10 = vpop.permute.xlu0 %740 }
 0x4fb   :  { %v743_v11 = vadd.f32 %v741_v10, %v726_v7  ;;  %v744_v12 = vadd.f32 %v741_v10, %v728_v8  ;;  %v745_v21 = vadd.f32 %v741_v10, %v730_v17  ;;  %v746_v13 = vadd.f32 %v741_v10, %v732_v9 }
 0x4fc   :  { %v911_v7 = vsub.s32 %v908_v4, %v1444_v2 }
 0x4fd   :  { %v747_v14 = vmul.f32 1.442695, %v743_v11  ;;  %v749_v15 = vmul.f32 1.442695, %v744_v12  ;;  %v751_v16 = vmul.f32 1.442695, %v745_v21 }
 0x4fe   :  { %v753_v18 = vmul.f32 1.442695, %v746_v13 }
 0x4ff   :  { %1164 = vpow2.f32 %v747_v14 }
 0x500   :  { %1166 = vpow2.f32 %v749_v15 }
 0x501   :  { %1168 = vpow2.f32 %v751_v16 }
 0x502   :  { %1170 = vpow2.f32 %v753_v18 }
 0x50c   :  { %v1165_v25 = vpop.eup %1164 }
 0x50d   :  { %v1167_v19 = vpop.eup %1166  ;;  %v990_v20 = vadd.f32 -1.0, %v1165_v25 }
 0x50e   :  { %v1169_v22 = vpop.eup %1168  ;;  %v991_v24 = vadd.f32 -1.0, %v1167_v19 }
 0x50f   :  { %v1171_v29 = vpop.eup %1170  ;;  %v992_v26 = vadd.f32 -1.0, %v1169_v22  ;;  %v759_v27 = vadd.f32 0.5, %v990_v20 }
 0x510   :  { %v993_v28 = vadd.f32 -1.0, %v1171_v29  ;;  %v760_v30 = vadd.f32 0.5, %v991_v24 }
 0x511   :  { %v761_v32 = vadd.f32 0.5, %v992_v26  ;;  %v763_v33 = vfloor.f32 %v759_v27 }
 0x512   :  { %v762_v35 = vadd.f32 0.5, %v993_v28  ;;  %v764_v36 = vfloor.f32 %v760_v30 }
 0x513   :  { %v765_v37 = vfloor.f32 %v761_v32  ;;  %v767_v38 = vmax.f32 %v763_v33, 0.0 }
 0x514   :  { %v766_v39 = vfloor.f32 %v762_v35  ;;  %v768_v40 = vmax.f32 %v764_v36, 0.0 }
 0x515   :  { %v769_v41 = vmax.f32 %v765_v37, 0.0  ;;  %v1125_v42 = vtrunc.f32 %v767_v38  ;;  %v793_v43 = vrot.slane %v767_v38, %v792_v31 }
 0x516   :  { %v770_v44 = vmax.f32 %v766_v39, 0.0  ;;  %v1127_v45 = vtrunc.f32 %v768_v40  ;;  %v798_v47 = vrot.slane %v768_v40, %v797_v34 }
 0x517   :  { %v1126_v48 = vcvt.f32.s32 %v1125_v42  ;;  %v1129_v49 = vtrunc.f32 %v769_v41  ;;  %v804_v50 = vrot.slane %v769_v41, %v792_v31 }
 0x518   :  { %v1128_v51 = vcvt.f32.s32 %v1127_v45  ;;  %v1131_v52 = vtrunc.f32 %v770_v44  ;;  %v808_v53 = vrot.slane %v770_v44, %v797_v34  ;;  %v800_v54 = vsel %vm799_vm9, %v798_v47, %v793_v43 }
 0x519   :  { %v1130_v55 = vcvt.f32.s32 %v1129_v49  ;;  %v889_v56 = vrot.slane %v1126_v48, %v792_v31 }
 0x51a   :  { %v1132_v57 = vcvt.f32.s32 %v1131_v52  ;;  %v809_v58 = vsel %vm799_vm9, %v808_v53, %v804_v50  ;;  %v893_v59 = vrot.slane %v1128_v51, %v797_v34 }
 0x51b   :  { %v811_v60 = vsel %vm810_vm10, %v809_v58, %v800_v54  ;;  %v898_v62 = vrot.slane %v1130_v55, %v792_v31 }
 0x51c   :  { %1123 = vmatmul.mubr.msk.f32.vlgmr.msra.gmra.mxu1 %vm812_vm11, %v811_v60  ;;  %v894_v63 = vsel %vm799_vm9, %v893_v59, %v889_v56  ;;  %v902_v46 = vrot.slane %v1132_v57, %v797_v34 }
 0x51e   :  { %v903_v61 = vsel %vm799_vm9, %v902_v46, %v898_v62 }
 0x51f   :  { %v904_v0 = vsel %vm810_vm10, %v903_v61, %v894_v63 }
 0x5dc   :  { %v881_v5 = vpop.f32.mrf.mxu1 }
 0x5dd   :  { %v1133_v6 = vtrunc.f32 %v881_v5 }
 0x5de   :  { %v1124_v8 = vpop.f32.mrf.mxu1 }
 0x5df   :  { %v1134_v17 = vcvt.f32.s32 %v1133_v6 }
 0x5e1   :  { %v905_v9 = vsub.s32 %v1134_v17, %v904_v0  ;;  %v937_v10 = vrot.slane %v1134_v17, %v911_v7 }
 0x5e3   :  { %v912_v11 = vrot.slane %v905_v9, %v911_v7  ;;  %v938_v12 = vcombine.high %v937_v10, %v937_v10  ;;  %v945_v21 = vrot.slane %v937_v10, %v911_v7 }
 0x5e5   :  { %v913_v13 = vcombine.high %v912_v11, %v912_v11  ;;  %v920_v14 = vrot.slane %v912_v11, %v911_v7  ;;  %v952_v15 = vrot.slane %v938_v12, %v911_v7  ;;  %953 = vst.msk [vmem:[%s1481_s12] sm:$0x1] %vm928_vm12, %v945_v21 }
 0x5e7   :  { %v927_v16 = vrot.slane %v913_v13, %v911_v7  ;;  %929 = vst.msk [vmem:[%s1480_s11] sm:$0x1] %vm928_vm12, %v920_v14  ;;  %954 = vst.msk [vmem:[%s1481_s12 + $0x1] sm:$0x1] %vm928_vm12, %v952_v15 }
 0x5e9   :  { %930 = vst.msk [vmem:[%s1480_s11 + $0x1] sm:$0x1] %vm928_vm12, %v927_v16 }
 0x5ea   :  { %963 = vsyncpa [#allocation4], 1 }
 0x5eb   :  { %964 = vsyncpa [#allocation6], 1 }
 0x5ec   :  { %965 = vsyncpa [#allocation9], 1 }

</bundles_post_ra>
